<compile_context>
chip_gen: v7x
topology: tpu7x:2x2x1
jax: 0.10.0
libtpu: 0.0.40
codegen_flags: <defaults>
</compile_context>

<pallas_src>
import functools
import math

import jax
import jax.numpy as jnp
from jax.experimental import pallas as pl
from jax.experimental.pallas import tpu as pltpu


ACT_DTYPE = jnp.bfloat16      # activation / matmul-input dtype (f32 accumulation)
WGT_DTYPE = jnp.bfloat16      # matmul weight dtype
VMEM_LIMIT = 32 * 1024 * 1024  # explicit scoped-VMEM limit (safe on v5e/v6e/v7x)
LN_EPS = 1e-5                  # PyTorch LayerNorm default


def _tile(dim, target):
    """Pick a tile size: `target` if it divides dim, else 128, else full dim."""
    if dim % target == 0:
        return target
    if dim % 128 == 0 and 128 < target:
        return 128
    return dim


# ---------------------------------------------------------------------------
# Kernel 1: tiled matmul + bias (+ optional relu)   y = act(x @ W + b)
# ---------------------------------------------------------------------------

def _linear_kernel(x_ref, w_ref, b_ref, o_ref, acc_ref, *, activation):
    @pl.when(pl.program_id(2) == 0)
    def _init():
        acc_ref[...] = jnp.zeros_like(acc_ref)

    acc_ref[...] += jnp.dot(x_ref[...], w_ref[...],
                            preferred_element_type=jnp.float32)

    @pl.when(pl.program_id(2) == pl.num_programs(2) - 1)
    def _finalize():
        y = acc_ref[...] + b_ref[...].astype(jnp.float32)
        if activation == "relu":
            y = jnp.maximum(y, 0.0)
        o_ref[...] = y.astype(o_ref.dtype)


def linear(x, w, b, activation=None, out_dtype=None):
    """x: (M, K) bf16, w: (K, N) bf16, b: (N,) f32 -> (M, N)."""
    M, K = x.shape
    N = w.shape[1]
    out_dtype = ACT_DTYPE if out_dtype is None else out_dtype
    tm, tn, tk = _tile(M, 256), _tile(N, 256), _tile(K, 512)
    grid = (M // tm, N // tn, K // tk)
    bytes_acc = (M * K + K * N) * 2 + M * N * jnp.dtype(out_dtype).itemsize + N * 4
    return pl.pallas_call(
        functools.partial(_linear_kernel, activation=activation),
        out_shape=jax.ShapeDtypeStruct((M, N), out_dtype),
        grid=grid,
        in_specs=[
            pl.BlockSpec((tm, tk), lambda i, j, k: (i, k)),
            pl.BlockSpec((tk, tn), lambda i, j, k: (k, j)),
            pl.BlockSpec((1, tn), lambda i, j, k: (0, j)),
        ],
        out_specs=pl.BlockSpec((tm, tn), lambda i, j, k: (i, j)),
        scratch_shapes=[pltpu.VMEM((tm, tn), jnp.float32)],
        compiler_params=pltpu.CompilerParams(
            dimension_semantics=("parallel", "parallel", "arbitrary"),
            vmem_limit_bytes=VMEM_LIMIT),
        cost_estimate=pl.CostEstimate(flops=2 * M * N * K, transcendentals=0,
                                      bytes_accessed=int(bytes_acc)),
    )(x, w, b.reshape(1, N))


# ---------------------------------------------------------------------------
# Kernel 2: multi-head attention (causal mask generated in-kernel)
#   q: (1, tq, D), kv: (1, S, 2D) packed [K | V]  ->  (1, tq, D)
# ---------------------------------------------------------------------------

def _attn_kernel(q_ref, kv_ref, o_ref, *, nhead, scale, causal, q_tile):
    q = q_ref[0]                      # (tq, D)  bf16
    kv = kv_ref[0]                    # (S, 2D)  bf16
    tq, D = q.shape
    S = kv.shape[0]
    hd = D // nhead
    k = kv[:, :D]
    v = kv[:, D:]

    if causal:
        q_start = pl.program_id(1) * q_tile
        row = q_start + jax.lax.broadcasted_iota(jnp.int32, (tq, S), 0)
        col = jax.lax.broadcasted_iota(jnp.int32, (tq, S), 1)
        mask = row >= col

    outs = []
    for h in range(nhead):            # static unroll over heads
        sl = slice(h * hd, (h + 1) * hd)
        s = jax.lax.dot_general(q[:, sl], k[:, sl],
                                (((1,), (1,)), ((), ())),
                                preferred_element_type=jnp.float32) * scale
        if causal:
            s = jnp.where(mask, s, -1e30)        # finite large-negative (NaN-safe)
        m = jnp.max(s, axis=-1, keepdims=True)   # softmax in f32 (v5e-safe)
        p = jnp.exp(s - m)
        l = jnp.sum(p, axis=-1, keepdims=True)
        o = jnp.dot(p.astype(jnp.bfloat16), v[:, sl],
                    preferred_element_type=jnp.float32)
        outs.append(o * pl.reciprocal(l, approx=True))   # EUP, not VALU divide
    # heads stay packed: output last dim is d_model (lane-dense store)
    o_ref[0] = jnp.concatenate(outs, axis=-1).astype(o_ref.dtype)


def attention(q, kv, *, nhead, causal):
    """q: (B, Tq, D), kv: (B, S, 2D) packed [K|V] -> (B, Tq, D)."""
    B, Tq, D = q.shape
    S = kv.shape[1]
    tq = _tile(Tq, 128)
    scale = 1.0 / math.sqrt(D // nhead)
    # TODO(synk): for long sequences add a kv-tile grid axis with online-softmax
    # (flash) accumulators so K/V never need to be fully VMEM-resident.
    return pl.pallas_call(
        functools.partial(_attn_kernel, nhead=nhead, scale=scale,
                          causal=causal, q_tile=tq),
        out_shape=jax.ShapeDtypeStruct((B, Tq, D), ACT_DTYPE),
        grid=(B, Tq // tq),
        in_specs=[
            pl.BlockSpec((1, tq, D), lambda b, qi: (b, qi, 0)),
            pl.BlockSpec((1, S, 2 * D), lambda b, qi: (b, 0, 0)),
        ],
        out_specs=pl.BlockSpec((1, tq, D), lambda b, qi: (b, qi, 0)),
        compiler_params=pltpu.CompilerParams(
            dimension_semantics=("parallel", "parallel"),
            vmem_limit_bytes=VMEM_LIMIT),
    )(q, kv)


# ---------------------------------------------------------------------------
# Kernel 3: attention out-projection + residual + LayerNorm (fused)
#   LN(residual + x @ Wo + bo)
# ---------------------------------------------------------------------------

def _proj_add_ln_kernel(x_ref, w_ref, b_ref, r_ref, g_ref, be_ref, o_ref, *, eps):
    y = jnp.dot(x_ref[...], w_ref[...], preferred_element_type=jnp.float32)
    y = y + b_ref[...].astype(jnp.float32) + r_ref[...].astype(jnp.float32)
    mu = jnp.mean(y, axis=-1, keepdims=True)
    var = jnp.mean((y - mu) ** 2, axis=-1, keepdims=True)
    yn = (y - mu) * jax.lax.rsqrt(var + eps)
    o_ref[...] = (yn * g_ref[...] + be_ref[...]).astype(o_ref.dtype)


def proj_add_ln(x, w, b, residual, gamma, beta):
    M, K = x.shape
    N = w.shape[1]
    tm = _tile(M, 256)
    return pl.pallas_call(
        functools.partial(_proj_add_ln_kernel, eps=LN_EPS),
        out_shape=jax.ShapeDtypeStruct((M, N), ACT_DTYPE),
        grid=(M // tm,),
        in_specs=[
            pl.BlockSpec((tm, K), lambda i: (i, 0)),
            pl.BlockSpec((K, N), lambda i: (0, 0)),
            pl.BlockSpec((1, N), lambda i: (0, 0)),
            pl.BlockSpec((tm, N), lambda i: (i, 0)),
            pl.BlockSpec((1, N), lambda i: (0, 0)),
            pl.BlockSpec((1, N), lambda i: (0, 0)),
        ],
        out_specs=pl.BlockSpec((tm, N), lambda i: (i, 0)),
        compiler_params=pltpu.CompilerParams(
            dimension_semantics=("parallel",), vmem_limit_bytes=VMEM_LIMIT),
        cost_estimate=pl.CostEstimate(flops=2 * M * N * K, transcendentals=0,
                                      bytes_accessed=int((2 * M * N + M * K + K * N) * 2)),
    )(x, w, b.reshape(1, N), residual, gamma.reshape(1, N), beta.reshape(1, N))


# ---------------------------------------------------------------------------
# Kernel 4: FFN + residual + LayerNorm (fully fused, intermediate stays in VMEM)
#   LN(x + relu(x @ W1 + b1) @ W2 + b2)
# ---------------------------------------------------------------------------

def _ffn_add_ln_kernel(x_ref, w1_ref, b1_ref, w2_ref, b2_ref, g_ref, be_ref,
                       o_ref, *, eps):
    x = x_ref[...]                                             # bf16 (tm, D)
    h = jnp.dot(x, w1_ref[...], preferred_element_type=jnp.float32)
    h = jnp.maximum(h + b1_ref[...].astype(jnp.float32), 0.0)  # relu, f32
    y = jnp.dot(h.astype(jnp.bfloat16), w2_ref[...],
                preferred_element_type=jnp.float32)
    y = y + b2_ref[...].astype(jnp.float32) + x.astype(jnp.float32)
    mu = jnp.mean(y, axis=-1, keepdims=True)
    var = jnp.mean((y - mu) ** 2, axis=-1, keepdims=True)
    yn = (y - mu) * jax.lax.rsqrt(var + eps)
    o_ref[...] = (yn * g_ref[...] + be_ref[...]).astype(o_ref.dtype)


def ffn_add_ln(x, w1, b1, w2, b2, gamma, beta):
    M, D = x.shape
    F = w1.shape[1]
    tm = _tile(M, 256)
    return pl.pallas_call(
        functools.partial(_ffn_add_ln_kernel, eps=LN_EPS),
        out_shape=jax.ShapeDtypeStruct((M, D), ACT_DTYPE),
        grid=(M // tm,),
        in_specs=[
            pl.BlockSpec((tm, D), lambda i: (i, 0)),
            pl.BlockSpec((D, F), lambda i: (0, 0)),
            pl.BlockSpec((1, F), lambda i: (0, 0)),
            pl.BlockSpec((F, D), lambda i: (0, 0)),
            pl.BlockSpec((1, D), lambda i: (0, 0)),
            pl.BlockSpec((1, D), lambda i: (0, 0)),
            pl.BlockSpec((1, D), lambda i: (0, 0)),
        ],
        out_specs=pl.BlockSpec((tm, D), lambda i: (i, 0)),
        compiler_params=pltpu.CompilerParams(
            dimension_semantics=("parallel",), vmem_limit_bytes=VMEM_LIMIT),
        cost_estimate=pl.CostEstimate(flops=4 * M * D * F, transcendentals=0,
                                      bytes_accessed=int((2 * M * D + 2 * D * F) * 2)),
    )(x, w1, b1.reshape(1, F), w2, b2.reshape(1, D),
      gamma.reshape(1, D), beta.reshape(1, D))


# ---------------------------------------------------------------------------
# Parameter init (deterministic, synthetic)
# ---------------------------------------------------------------------------

def init_params(key, *, target_len, output_dim, d_model, num_layers,
                dim_feedforward):
    def nrm(k, shape, scale=0.02):
        return scale * jax.random.normal(k, shape, jnp.float32)

    keys = jax.random.split(key, 3 + num_layers)

    # fc_out padded to a lane-dense (multiple of 128) output dim; extra columns
    # are zero and sliced off in the wrapper.
    n_pad = ((output_dim + 127) // 128) * 128
    fc_w = jnp.zeros((d_model, n_pad), jnp.float32)
    fc_w = fc_w.at[:, :output_dim].set(nrm(keys[2], (d_model, output_dim)))

    params = {
        "embedding": nrm(keys[0], (output_dim, d_model)),
        "pos_embedding": nrm(keys[1], (target_len, d_model)),
        "fc_out_w": fc_w.astype(WGT_DTYPE),
        "fc_out_b": jnp.zeros((n_pad,), jnp.float32),
        "layers": [],
    }
    D, F = d_model, dim_feedforward
    for l in range(num_layers):
        lk = jax.random.split(keys[3 + l], 6)
        layer = {
            # self attention: fused QKV weight (D, 3D) = [Wq | Wk | Wv]
            "sa_wqkv": nrm(lk[0], (D, 3 * D)).astype(WGT_DTYPE),
            "sa_bqkv": jnp.zeros((3 * D,), jnp.float32),
            "sa_wo": nrm(lk[1], (D, D)).astype(WGT_DTYPE),
            "sa_bo": jnp.zeros((D,), jnp.float32),
            # cross attention: Q (D, D), fused KV (D, 2D) = [Wk | Wv]
            "ca_wq": nrm(lk[2], (D, D)).astype(WGT_DTYPE),
            "ca_bq": jnp.zeros((D,), jnp.float32),
            "ca_wkv": nrm(lk[3], (D, 2 * D)).astype(WGT_DTYPE),
            "ca_bkv": jnp.zeros((2 * D,), jnp.float32),
            "ca_wo": nrm(lk[4], (D, D)).astype(WGT_DTYPE),
            "ca_bo": jnp.zeros((D,), jnp.float32),
            # feed-forward
            "ff_w1": nrm(lk[5], (D, F)).astype(WGT_DTYPE),
            "ff_b1": jnp.zeros((F,), jnp.float32),
            "ff_w2": nrm(jax.random.fold_in(lk[5], 1), (F, D)).astype(WGT_DTYPE),
            "ff_b2": jnp.zeros((D,), jnp.float32),
            # layer norms (f32)
            "ln1_g": jnp.ones((D,), jnp.float32), "ln1_b": jnp.zeros((D,), jnp.float32),
            "ln2_g": jnp.ones((D,), jnp.float32), "ln2_b": jnp.zeros((D,), jnp.float32),
            "ln3_g": jnp.ones((D,), jnp.float32), "ln3_b": jnp.zeros((D,), jnp.float32),
        }
        params["layers"].append(layer)
    return params


# ---------------------------------------------------------------------------
# Forward pass
# ---------------------------------------------------------------------------

def decoder_layer_forward(layer, x, memory, nhead):
    B, T, D = x.shape
    S = memory.shape[1]

    # --- self-attention (causal): fused QKV matmul -> attention -> fused
    #     out-proj + residual + LN1
    qkv = linear(x.reshape(B * T, D), layer["sa_wqkv"], layer["sa_bqkv"])
    qkv = qkv.reshape(B, T, 3 * D)
    sa = attention(qkv[..., :D], qkv[..., D:], nhead=nhead, causal=True)
    x = proj_add_ln(sa.reshape(B * T, D), layer["sa_wo"], layer["sa_bo"],
                    x.reshape(B * T, D), layer["ln1_g"], layer["ln1_b"]
                    ).reshape(B, T, D)

    # --- cross-attention: Q matmul + fused KV matmul -> attention -> fused
    #     out-proj + residual + LN2
    q = linear(x.reshape(B * T, D), layer["ca_wq"], layer["ca_bq"]).reshape(B, T, D)
    kv = linear(memory.reshape(B * S, D), layer["ca_wkv"], layer["ca_bkv"]
                ).reshape(B, S, 2 * D)
    ca = attention(q, kv, nhead=nhead, causal=False)
    x = proj_add_ln(ca.reshape(B * T, D), layer["ca_wo"], layer["ca_bo"],
                    x.reshape(B * T, D), layer["ln2_g"], layer["ln2_b"]
                    ).reshape(B, T, D)

    # --- FFN + residual + LN3, single fused kernel
    x = ffn_add_ln(x.reshape(B * T, D), layer["ff_w1"], layer["ff_b1"],
                   layer["ff_w2"], layer["ff_b2"],
                   layer["ln3_g"], layer["ln3_b"]).reshape(B, T, D)
    return x


def transformer_decoder_forward(params, targets, memory, *, nhead, output_dim):
    """targets: (B, T) int32; memory: (B, S, d_model) -> (B, T, output_dim)."""
    B, T = targets.shape
    D = params["embedding"].shape[1]

    # token + positional embedding (gather is glue, plain JAX), then bf16 acts
    emb = jnp.take(params["embedding"], targets, axis=0)          # (B, T, D)
    x = (emb + params["pos_embedding"][:T][None, :, :]).astype(ACT_DTYPE)
    mem = memory.astype(ACT_DTYPE)

    # TODO(synk): dropout treated as identity (inference / dropout=0.0).
    for layer in params["layers"]:
        x = decoder_layer_forward(layer, x, mem, nhead)

    out = linear(x.reshape(B * T, D), params["fc_out_w"], params["fc_out_b"],
                 out_dtype=jnp.float32)                           # (B*T, n_pad)
    out = out[:, :output_dim]                                     # drop lane padding
    return out.reshape(B, T, output_dim)


# ---------------------------------------------------------------------------
# Demo
# ---------------------------------------------------------------------------

if __name__ == "__main__":
    target_len = 8
    output_dim = 16
    d_model = 32
    nhead = 4
    num_layers = 2
    dim_feedforward = 64
    # dropout = 0.0 (identity at inference); activation = "relu"

    B, T, S = 2, 8, 10

    key = jax.random.PRNGKey(0)
    k_params, k_tgt, k_mem = jax.random.split(key, 3)

    params = init_params(
        k_params,
        target_len=target_len,
        output_dim=output_dim,
        d_model=d_model,
        num_layers=num_layers,
        dim_feedforward=dim_feedforward,
    )

    targets = jax.random.randint(k_tgt, (B, T), 0, output_dim, dtype=jnp.int32)
    memory = jax.random.normal(k_mem, (B, S, d_model), jnp.float32)

    fwd = jax.jit(functools.partial(transformer_decoder_forward,
                                    nhead=nhead, output_dim=output_dim))
    out = fwd(params, targets, memory)
    out = jax.block_until_ready(out)

    assert out.shape == (B, T, output_dim), out.shape
    assert jnp.all(jnp.isfinite(out))
    print("KERNEL_OK")
</pallas_src>

<mosaic_0001>
module attributes {stable_mosaic.version = 11 : i64} {
  func.func @_linear_kernel(%arg0: i32, %arg1: i32, %arg2: i32, %arg3: memref<16x32xbf16, #tpu.memory_space<vmem>>, %arg4: memref<32x96xbf16, #tpu.memory_space<vmem>>, %arg5: memref<1x96xf32, #tpu.memory_space<vmem>>, %arg6: memref<16x96xbf16, #tpu.memory_space<vmem>>, %arg7: memref<16x96xf32, #tpu.memory_space<vmem>>) attributes {dimension_semantics = [#tpu.dimension_semantics<parallel>, #tpu.dimension_semantics<parallel>, #tpu.dimension_semantics<arbitrary>], iteration_bounds = array<i64: 1, 1, 1>, scalar_prefetch = 0 : i64, scratch_operands = 1 : i64, tpu.core_type = #tpu.core_type<tc>, window_params = [{transform_indices = @transform_0, window_bounds = array<i64: 16, 32>}, {transform_indices = @transform_1, window_bounds = array<i64: 32, 96>}, {transform_indices = @transform_2, window_bounds = array<i64: 1, 96>}, {transform_indices = @transform_3, window_bounds = array<i64: 16, 96>}]} {
    %c0_i32 = arith.constant 0 : i32
    %0 = arith.cmpi eq, %arg2, %c0_i32 : i32
    %1 = arith.extui %0 : i1 to i32
    %c0_i32_0 = arith.constant 0 : i32
    %2 = arith.cmpi ne, %1, %c0_i32_0 : i32
    scf.if %2 {
      %cst_10 = arith.constant 0.000000e+00 : f32
      %12 = vector.broadcast %cst_10 : f32 to vector<16x96xf32>
      %c0_11 = arith.constant 0 : index
      %c0_12 = arith.constant 0 : index
      %13 = vector.load %arg7[%c0_11, %c0_12] : memref<16x96xf32, #tpu.memory_space<vmem>>, vector<16x96xf32>
      tpu.vector_store %arg7[%c0_11, %c0_12], %12 {strides = array<i32>} : memref<16x96xf32, #tpu.memory_space<vmem>>, vector<16x96xf32>,
    } else {
    }
    %c0 = arith.constant 0 : index
    %c0_1 = arith.constant 0 : index
    %3 = vector.load %arg7[%c0, %c0_1] : memref<16x96xf32, #tpu.memory_space<vmem>>, vector<16x96xf32>
    %c0_2 = arith.constant 0 : index
    %c0_3 = arith.constant 0 : index
    %4 = vector.load %arg3[%c0_2, %c0_3] : memref<16x32xbf16, #tpu.memory_space<vmem>>, vector<16x32xbf16>
    %c0_4 = arith.constant 0 : index
    %c0_5 = arith.constant 0 : index
    %5 = vector.load %arg4[%c0_4, %c0_5] : memref<32x96xbf16, #tpu.memory_space<vmem>>, vector<32x96xbf16>
    %cst = arith.constant dense<0.000000e+00> : vector<16x96xf32>
    %6 = tpu.matmul %4, %5, %cst {dimension_numbers = #tpu.dot_dimension_numbers<[1], [0], [0], [1], [0, 0, 1, 1], [], []>} : vector<16x32xbf16>, vector<32x96xbf16>, vector<16x96xf32> -> vector<16x96xf32>
    %7 = arith.addf %3, %6 : vector<16x96xf32>
    %c0_6 = arith.constant 0 : index
    %c0_7 = arith.constant 0 : index
    %8 = vector.load %arg7[%c0_6, %c0_7] : memref<16x96xf32, #tpu.memory_space<vmem>>, vector<16x96xf32>
    tpu.vector_store %arg7[%c0_6, %c0_7], %7 {strides = array<i32>} : memref<16x96xf32, #tpu.memory_space<vmem>>, vector<16x96xf32>,
    %c0_i32_8 = arith.constant 0 : i32
    %9 = arith.cmpi eq, %arg2, %c0_i32_8 : i32
    %10 = arith.extui %9 : i1 to i32
    %c0_i32_9 = arith.constant 0 : i32
    %11 = arith.cmpi ne, %10, %c0_i32_9 : i32
    scf.if %11 {
      %c0_10 = arith.constant 0 : index
      %c0_11 = arith.constant 0 : index
      %12 = vector.load %arg7[%c0_10, %c0_11] : memref<16x96xf32, #tpu.memory_space<vmem>>, vector<16x96xf32>
      %c0_12 = arith.constant 0 : index
      %c0_13 = arith.constant 0 : index
      %13 = vector.load %arg5[%c0_12, %c0_13] : memref<1x96xf32, #tpu.memory_space<vmem>>, vector<1x96xf32>
      %14 = vector.broadcast %13 : vector<1x96xf32> to vector<16x96xf32>
      %15 = arith.addf %12, %14 : vector<16x96xf32>
      %16 = arith.truncf %15 : vector<16x96xf32> to vector<16x96xbf16>
      %c0_14 = arith.constant 0 : index
      %c0_15 = arith.constant 0 : index
      %17 = vector.load %arg6[%c0_14, %c0_15] : memref<16x96xbf16, #tpu.memory_space<vmem>>, vector<16x96xbf16>
      tpu.vector_store %arg6[%c0_14, %c0_15], %16 {strides = array<i32>} : memref<16x96xbf16, #tpu.memory_space<vmem>>, vector<16x96xbf16>,
    } else {
    }
    return
  }
  func.func @transform_0(%arg0: i32, %arg1: i32, %arg2: i32) -> (i32, i32) {
    %c0_i32 = arith.constant 0 : i32
    return %arg0, %arg2 : i32, i32
  }
  func.func @transform_1(%arg0: i32, %arg1: i32, %arg2: i32) -> (i32, i32) {
    %c0_i32 = arith.constant 0 : i32
    return %arg2, %arg1 : i32, i32
  }
  func.func @transform_2(%arg0: i32, %arg1: i32, %arg2: i32) -> (i32, i32) {
    %c0_i32 = arith.constant 0 : i32
    %c0_i32_0 = arith.constant 0 : i32
    return %c0_i32, %arg1 : i32, i32
  }
  func.func @transform_3(%arg0: i32, %arg1: i32, %arg2: i32) -> (i32, i32) {
    %c0_i32 = arith.constant 0 : i32
    return %arg0, %arg1 : i32, i32
  }
}

module attributes {stable_mosaic.version = 11 : i64} {
  func.func @_proj_add_ln_kernel(%arg0: i32, %arg1: memref<16x32xbf16, #tpu.memory_space<vmem>>, %arg2: memref<32x32xbf16, #tpu.memory_space<vmem>>, %arg3: memref<1x32xf32, #tpu.memory_space<vmem>>, %arg4: memref<16x32xbf16, #tpu.memory_space<vmem>>, %arg5: memref<1x32xf32, #tpu.memory_space<vmem>>, %arg6: memref<1x32xf32, #tpu.memory_space<vmem>>, %arg7: memref<16x32xbf16, #tpu.memory_space<vmem>>) attributes {dimension_semantics = [#tpu.dimension_semantics<parallel>], iteration_bounds = array<i64: 1>, scalar_prefetch = 0 : i64, scratch_operands = 0 : i64, tpu.core_type = #tpu.core_type<tc>, window_params = [{transform_indices = @transform_0, window_bounds = array<i64: 16, 32>}, {pipeline_mode = #tpu.pipeline_mode<synchronous>, transform_indices = @transform_1, window_bounds = array<i64: 32, 32>}, {pipeline_mode = #tpu.pipeline_mode<synchronous>, transform_indices = @transform_2, window_bounds = array<i64: 1, 32>}, {transform_indices = @transform_3, window_bounds = array<i64: 16, 32>}, {pipeline_mode = #tpu.pipeline_mode<synchronous>, transform_indices = @transform_4, window_bounds = array<i64: 1, 32>}, {pipeline_mode = #tpu.pipeline_mode<synchronous>, transform_indices = @transform_5, window_bounds = array<i64: 1, 32>}, {transform_indices = @transform_6, window_bounds = array<i64: 16, 32>}]} {
    %c0 = arith.constant 0 : index
    %c0_0 = arith.constant 0 : index
    %0 = vector.load %arg1[%c0, %c0_0] : memref<16x32xbf16, #tpu.memory_space<vmem>>, vector<16x32xbf16>
    %c0_1 = arith.constant 0 : index
    %c0_2 = arith.constant 0 : index
    %1 = vector.load %arg2[%c0_1, %c0_2] : memref<32x32xbf16, #tpu.memory_space<vmem>>, vector<32x32xbf16>
    %cst = arith.constant dense<0.000000e+00> : vector<16x32xf32>
    %2 = tpu.matmul %0, %1, %cst {dimension_numbers = #tpu.dot_dimension_numbers<[1], [0], [0], [1], [0, 0, 1, 1], [], []>} : vector<16x32xbf16>, vector<32x32xbf16>, vector<16x32xf32> -> vector<16x32xf32>
    %c0_3 = arith.constant 0 : index
    %c0_4 = arith.constant 0 : index
    %3 = vector.load %arg3[%c0_3, %c0_4] : memref<1x32xf32, #tpu.memory_space<vmem>>, vector<1x32xf32>
    %4 = vector.broadcast %3 : vector<1x32xf32> to vector<16x32xf32>
    %5 = arith.addf %2, %4 : vector<16x32xf32>
    %c0_5 = arith.constant 0 : index
    %c0_6 = arith.constant 0 : index
    %6 = vector.load %arg4[%c0_5, %c0_6] : memref<16x32xbf16, #tpu.memory_space<vmem>>, vector<16x32xbf16>
    %7 = arith.extf %6 : vector<16x32xbf16> to vector<16x32xf32>
    %8 = arith.addf %5, %7 : vector<16x32xf32>
    %cst_7 = arith.constant dense<0.000000e+00> : vector<16xf32>
    %9 = vector.multi_reduction <add>, %8, %cst_7 [1] : vector<16x32xf32> to vector<16xf32>
    %10 = vector.shape_cast %9 : vector<16xf32> to vector<16x1xf32>
    %cst_8 = arith.constant 3.200000e+01 : f32
    %11 = vector.broadcast %cst_8 : f32 to vector<16x1xf32>
    %12 = arith.divf %10, %11 : vector<16x1xf32>
    %13 = vector.broadcast %12 : vector<16x1xf32> to vector<16x32xf32>
    %14 = arith.subf %8, %13 : vector<16x32xf32>
    %15 = arith.mulf %14, %14 : vector<16x32xf32>
    %cst_9 = arith.constant dense<0.000000e+00> : vector<16xf32>
    %16 = vector.multi_reduction <add>, %15, %cst_9 [1] : vector<16x32xf32> to vector<16xf32>
    %17 = vector.shape_cast %16 : vector<16xf32> to vector<16x1xf32>
    %cst_10 = arith.constant 3.200000e+01 : f32
    %18 = vector.broadcast %cst_10 : f32 to vector<16x1xf32>
    %19 = arith.divf %17, %18 : vector<16x1xf32>
    %20 = vector.broadcast %12 : vector<16x1xf32> to vector<16x32xf32>
    %21 = arith.subf %8, %20 : vector<16x32xf32>
    %cst_11 = arith.constant 9.99999974E-6 : f32
    %22 = vector.broadcast %cst_11 : f32 to vector<16x1xf32>
    %23 = arith.addf %19, %22 : vector<16x1xf32>
    %24 = math.rsqrt %23 : vector<16x1xf32>
    %25 = vector.broadcast %24 : vector<16x1xf32> to vector<16x32xf32>
    %26 = arith.mulf %21, %25 : vector<16x32xf32>
    %c0_12 = arith.constant 0 : index
    %c0_13 = arith.constant 0 : index
    %27 = vector.load %arg5[%c0_12, %c0_13] : memref<1x32xf32, #tpu.memory_space<vmem>>, vector<1x32xf32>
    %28 = vector.broadcast %27 : vector<1x32xf32> to vector<16x32xf32>
    %29 = arith.mulf %26, %28 : vector<16x32xf32>
    %c0_14 = arith.constant 0 : index
    %c0_15 = arith.constant 0 : index
    %30 = vector.load %arg6[%c0_14, %c0_15] : memref<1x32xf32, #tpu.memory_space<vmem>>, vector<1x32xf32>
    %31 = vector.broadcast %30 : vector<1x32xf32> to vector<16x32xf32>
    %32 = arith.addf %29, %31 : vector<16x32xf32>
    %33 = arith.truncf %32 : vector<16x32xf32> to vector<16x32xbf16>
    %c0_16 = arith.constant 0 : index
    %c0_17 = arith.constant 0 : index
    %34 = vector.load %arg7[%c0_16, %c0_17] : memref<16x32xbf16, #tpu.memory_space<vmem>>, vector<16x32xbf16>
    tpu.vector_store %arg7[%c0_16, %c0_17], %33 {strides = array<i32>} : memref<16x32xbf16, #tpu.memory_space<vmem>>, vector<16x32xbf16>,
    return
  }
  func.func @transform_0(%arg0: i32) -> (i32, i32) {
    %c0_i32 = arith.constant 0 : i32
    %c0_i32_0 = arith.constant 0 : i32
    return %arg0, %c0_i32 : i32, i32
  }
  func.func @transform_1(%arg0: i32) -> (i32, i32) {
    %c0_i32 = arith.constant 0 : i32
    %c0_i32_0 = arith.constant 0 : i32
    %c0_i32_1 = arith.constant 0 : i32
    return %c0_i32, %c0_i32_0 : i32, i32
  }
  func.func @transform_2(%arg0: i32) -> (i32, i32) {
    %c0_i32 = arith.constant 0 : i32
    %c0_i32_0 = arith.constant 0 : i32
    %c0_i32_1 = arith.constant 0 : i32
    return %c0_i32, %c0_i32_0 : i32, i32
  }
  func.func @transform_3(%arg0: i32) -> (i32, i32) {
    %c0_i32 = arith.constant 0 : i32
    %c0_i32_0 = arith.constant 0 : i32
    return %arg0, %c0_i32 : i32, i32
  }
  func.func @transform_4(%arg0: i32) -> (i32, i32) {
    %c0_i32 = arith.constant 0 : i32
    %c0_i32_0 = arith.constant 0 : i32
    %c0_i32_1 = arith.constant 0 : i32
    return %c0_i32, %c0_i32_0 : i32, i32
  }
  func.func @transform_5(%arg0: i32) -> (i32, i32) {
    %c0_i32 = arith.constant 0 : i32
    %c0_i32_0 = arith.constant 0 : i32
    %c0_i32_1 = arith.constant 0 : i32
    return %c0_i32, %c0_i32_0 : i32, i32
  }
  func.func @transform_6(%arg0: i32) -> (i32, i32) {
    %c0_i32 = arith.constant 0 : i32
    %c0_i32_0 = arith.constant 0 : i32
    return %arg0, %c0_i32 : i32, i32
  }
}

module attributes {stable_mosaic.version = 11 : i64} {
  func.func @_attn_kernel(%arg0: i32, %arg1: i32, %arg2: memref<1x8x32xbf16, #tpu.memory_space<vmem>>, %arg3: memref<1x8x64xbf16, #tpu.memory_space<vmem>>, %arg4: memref<1x8x32xbf16, #tpu.memory_space<vmem>>) attributes {dimension_semantics = [#tpu.dimension_semantics<parallel>, #tpu.dimension_semantics<parallel>], iteration_bounds = array<i64: 2, 1>, scalar_prefetch = 0 : i64, scratch_operands = 0 : i64, tpu.core_type = #tpu.core_type<tc>, window_params = [{transform_indices = @transform_0, window_bounds = array<i64: 1, 8, 32>}, {transform_indices = @transform_1, window_bounds = array<i64: 1, 8, 64>}, {transform_indices = @transform_2, window_bounds = array<i64: 1, 8, 32>}]} {
    %c0 = arith.constant 0 : index
    %c0_0 = arith.constant 0 : index
    %c0_1 = arith.constant 0 : index
    %0 = vector.load %arg2[%c0, %c0_0, %c0_1] : memref<1x8x32xbf16, #tpu.memory_space<vmem>>, vector<1x8x32xbf16>
    %1 = vector.shape_cast %0 : vector<1x8x32xbf16> to vector<8x32xbf16>
    %c0_2 = arith.constant 0 : index
    %c0_3 = arith.constant 0 : index
    %c0_4 = arith.constant 0 : index
    %2 = vector.load %arg3[%c0_2, %c0_3, %c0_4] : memref<1x8x64xbf16, #tpu.memory_space<vmem>>, vector<1x8x64xbf16>
    %3 = vector.shape_cast %2 : vector<1x8x64xbf16> to vector<8x64xbf16>
    %4 = vector.extract_strided_slice %3 {offsets = [0, 0], sizes = [8, 32], strides = [1, 1]} : vector<8x64xbf16> to vector<8x32xbf16>
    %5 = vector.extract_strided_slice %3 {offsets = [0, 32], sizes = [8, 32], strides = [1, 1]} : vector<8x64xbf16> to vector<8x32xbf16>
    %c8_i32 = arith.constant 8 : i32
    %6 = arith.muli %arg1, %c8_i32 : i32
    %7 = tpu.iota {dimensions = array<i32: 0>} : vector<8x8xi32>
    %8 = vector.broadcast %6 : i32 to vector<8x8xi32>
    %9 = arith.addi %8, %7 : vector<8x8xi32>
    %10 = tpu.iota {dimensions = array<i32: 1>} : vector<8x8xi32>
    %11 = arith.cmpi sge, %9, %10 : vector<8x8xi32>
    %12 = vector.extract_strided_slice %1 {offsets = [0, 0], sizes = [8, 8], strides = [1, 1]} : vector<8x32xbf16> to vector<8x8xbf16>
    %13 = vector.extract_strided_slice %4 {offsets = [0, 0], sizes = [8, 8], strides = [1, 1]} : vector<8x32xbf16> to vector<8x8xbf16>
    %cst = arith.constant dense<0.000000e+00> : vector<8x8xf32>
    %14 = tpu.matmul %12, %13, %cst {dimension_numbers = #tpu.dot_dimension_numbers<[1], [1], [0], [0], [0, 0, 1, 0], [], []>} : vector<8x8xbf16>, vector<8x8xbf16>, vector<8x8xf32> -> vector<8x8xf32>
    %cst_5 = arith.constant 0.353553385 : f32
    %15 = vector.broadcast %cst_5 : f32 to vector<8x8xf32>
    %16 = arith.mulf %14, %15 : vector<8x8xf32>
    %cst_6 = arith.constant -1.000000e+30 : f32
    %17 = vector.broadcast %cst_6 : f32 to vector<8x8xf32>
    %18 = arith.select %11, %16, %17 : vector<8x8xi1>, vector<8x8xf32>
    %cst_7 = arith.constant dense<0xFF800000> : vector<8xf32>
    %19 = vector.multi_reduction <maximumf>, %18, %cst_7 [1] : vector<8x8xf32> to vector<8xf32>
    %20 = vector.shape_cast %19 : vector<8xf32> to vector<8x1xf32>
    %21 = vector.broadcast %20 : vector<8x1xf32> to vector<8x8xf32>
    %22 = arith.subf %18, %21 : vector<8x8xf32>
    %23 = math.exp %22 : vector<8x8xf32>
    %cst_8 = arith.constant dense<0.000000e+00> : vector<8xf32>
    %24 = vector.multi_reduction <add>, %23, %cst_8 [1] : vector<8x8xf32> to vector<8xf32>
    %25 = vector.shape_cast %24 : vector<8xf32> to vector<8x1xf32>
    %26 = arith.truncf %23 : vector<8x8xf32> to vector<8x8xbf16>
    %27 = vector.extract_strided_slice %5 {offsets = [0, 0], sizes = [8, 8], strides = [1, 1]} : vector<8x32xbf16> to vector<8x8xbf16>
    %cst_9 = arith.constant dense<0.000000e+00> : vector<8x8xf32>
    %28 = tpu.matmul %26, %27, %cst_9 {dimension_numbers = #tpu.dot_dimension_numbers<[1], [0], [0], [1], [0, 0, 1, 1], [], []>} : vector<8x8xbf16>, vector<8x8xbf16>, vector<8x8xf32> -> vector<8x8xf32>
    %29 = tpu.reciprocal %25 {approx = true} : vector<8x1xf32> -> vector<8x1xf32>
    %30 = vector.broadcast %29 : vector<8x1xf32> to vector<8x8xf32>
    %31 = arith.mulf %28, %30 : vector<8x8xf32>
    %32 = vector.extract_strided_slice %1 {offsets = [0, 8], sizes = [8, 8], strides = [1, 1]} : vector<8x32xbf16> to vector<8x8xbf16>
    %33 = vector.extract_strided_slice %4 {offsets = [0, 8], sizes = [8, 8], strides = [1, 1]} : vector<8x32xbf16> to vector<8x8xbf16>
    %cst_10 = arith.constant dense<0.000000e+00> : vector<8x8xf32>
    %34 = tpu.matmul %32, %33, %cst_10 {dimension_numbers = #tpu.dot_dimension_numbers<[1], [1], [0], [0], [0, 0, 1, 0], [], []>} : vector<8x8xbf16>, vector<8x8xbf16>, vector<8x8xf32> -> vector<8x8xf32>
    %cst_11 = arith.constant 0.353553385 : f32
    %35 = vector.broadcast %cst_11 : f32 to vector<8x8xf32>
    %36 = arith.mulf %34, %35 : vector<8x8xf32>
    %cst_12 = arith.constant -1.000000e+30 : f32
    %37 = vector.broadcast %cst_12 : f32 to vector<8x8xf32>
    %38 = arith.select %11, %36, %37 : vector<8x8xi1>, vector<8x8xf32>
    %cst_13 = arith.constant dense<0xFF800000> : vector<8xf32>
    %39 = vector.multi_reduction <maximumf>, %38, %cst_13 [1] : vector<8x8xf32> to vector<8xf32>
    %40 = vector.shape_cast %39 : vector<8xf32> to vector<8x1xf32>
    %41 = vector.broadcast %40 : vector<8x1xf32> to vector<8x8xf32>
    %42 = arith.subf %38, %41 : vector<8x8xf32>
    %43 = math.exp %42 : vector<8x8xf32>
    %cst_14 = arith.constant dense<0.000000e+00> : vector<8xf32>
    %44 = vector.multi_reduction <add>, %43, %cst_14 [1] : vector<8x8xf32> to vector<8xf32>
    %45 = vector.shape_cast %44 : vector<8xf32> to vector<8x1xf32>
    %46 = arith.truncf %43 : vector<8x8xf32> to vector<8x8xbf16>
    %47 = vector.extract_strided_slice %5 {offsets = [0, 8], sizes = [8, 8], strides = [1, 1]} : vector<8x32xbf16> to vector<8x8xbf16>
    %cst_15 = arith.constant dense<0.000000e+00> : vector<8x8xf32>
    %48 = tpu.matmul %46, %47, %cst_15 {dimension_numbers = #tpu.dot_dimension_numbers<[1], [0], [0], [1], [0, 0, 1, 1], [], []>} : vector<8x8xbf16>, vector<8x8xbf16>, vector<8x8xf32> -> vector<8x8xf32>
    %49 = tpu.reciprocal %45 {approx = true} : vector<8x1xf32> -> vector<8x1xf32>
    %50 = vector.broadcast %49 : vector<8x1xf32> to vector<8x8xf32>
    %51 = arith.mulf %48, %50 : vector<8x8xf32>
    %52 = vector.extract_strided_slice %1 {offsets = [0, 16], sizes = [8, 8], strides = [1, 1]} : vector<8x32xbf16> to vector<8x8xbf16>
    %53 = vector.extract_strided_slice %4 {offsets = [0, 16], sizes = [8, 8], strides = [1, 1]} : vector<8x32xbf16> to vector<8x8xbf16>
    %cst_16 = arith.constant dense<0.000000e+00> : vector<8x8xf32>
    %54 = tpu.matmul %52, %53, %cst_16 {dimension_numbers = #tpu.dot_dimension_numbers<[1], [1], [0], [0], [0, 0, 1, 0], [], []>} : vector<8x8xbf16>, vector<8x8xbf16>, vector<8x8xf32> -> vector<8x8xf32>
    %cst_17 = arith.constant 0.353553385 : f32
    %55 = vector.broadcast %cst_17 : f32 to vector<8x8xf32>
    %56 = arith.mulf %54, %55 : vector<8x8xf32>
    %cst_18 = arith.constant -1.000000e+30 : f32
    %57 = vector.broadcast %cst_18 : f32 to vector<8x8xf32>
    %58 = arith.select %11, %56, %57 : vector<8x8xi1>, vector<8x8xf32>
    %cst_19 = arith.constant dense<0xFF800000> : vector<8xf32>
    %59 = vector.multi_reduction <maximumf>, %58, %cst_19 [1] : vector<8x8xf32> to vector<8xf32>
    %60 = vector.shape_cast %59 : vector<8xf32> to vector<8x1xf32>
    %61 = vector.broadcast %60 : vector<8x1xf32> to vector<8x8xf32>
    %62 = arith.subf %58, %61 : vector<8x8xf32>
    %63 = math.exp %62 : vector<8x8xf32>
    %cst_20 = arith.constant dense<0.000000e+00> : vector<8xf32>
    %64 = vector.multi_reduction <add>, %63, %cst_20 [1] : vector<8x8xf32> to vector<8xf32>
    %65 = vector.shape_cast %64 : vector<8xf32> to vector<8x1xf32>
    %66 = arith.truncf %63 : vector<8x8xf32> to vector<8x8xbf16>
    %67 = vector.extract_strided_slice %5 {offsets = [0, 16], sizes = [8, 8], strides = [1, 1]} : vector<8x32xbf16> to vector<8x8xbf16>
    %cst_21 = arith.constant dense<0.000000e+00> : vector<8x8xf32>
    %68 = tpu.matmul %66, %67, %cst_21 {dimension_numbers = #tpu.dot_dimension_numbers<[1], [0], [0], [1], [0, 0, 1, 1], [], []>} : vector<8x8xbf16>, vector<8x8xbf16>, vector<8x8xf32> -> vector<8x8xf32>
    %69 = tpu.reciprocal %65 {approx = true} : vector<8x1xf32> -> vector<8x1xf32>
    %70 = vector.broadcast %69 : vector<8x1xf32> to vector<8x8xf32>
    %71 = arith.mulf %68, %70 : vector<8x8xf32>
    %72 = vector.extract_strided_slice %1 {offsets = [0, 24], sizes = [8, 8], strides = [1, 1]} : vector<8x32xbf16> to vector<8x8xbf16>
    %73 = vector.extract_strided_slice %4 {offsets = [0, 24], sizes = [8, 8], strides = [1, 1]} : vector<8x32xbf16> to vector<8x8xbf16>
    %cst_22 = arith.constant dense<0.000000e+00> : vector<8x8xf32>
    %74 = tpu.matmul %72, %73, %cst_22 {dimension_numbers = #tpu.dot_dimension_numbers<[1], [1], [0], [0], [0, 0, 1, 0], [], []>} : vector<8x8xbf16>, vector<8x8xbf16>, vector<8x8xf32> -> vector<8x8xf32>
    %cst_23 = arith.constant 0.353553385 : f32
    %75 = vector.broadcast %cst_23 : f32 to vector<8x8xf32>
    %76 = arith.mulf %74, %75 : vector<8x8xf32>
    %cst_24 = arith.constant -1.000000e+30 : f32
    %77 = vector.broadcast %cst_24 : f32 to vector<8x8xf32>
    %78 = arith.select %11, %76, %77 : vector<8x8xi1>, vector<8x8xf32>
    %cst_25 = arith.constant dense<0xFF800000> : vector<8xf32>
    %79 = vector.multi_reduction <maximumf>, %78, %cst_25 [1] : vector<8x8xf32> to vector<8xf32>
    %80 = vector.shape_cast %79 : vector<8xf32> to vector<8x1xf32>
    %81 = vector.broadcast %80 : vector<8x1xf32> to vector<8x8xf32>
    %82 = arith.subf %78, %81 : vector<8x8xf32>
    %83 = math.exp %82 : vector<8x8xf32>
    %cst_26 = arith.constant dense<0.000000e+00> : vector<8xf32>
    %84 = vector.multi_reduction <add>, %83, %cst_26 [1] : vector<8x8xf32> to vector<8xf32>
    %85 = vector.shape_cast %84 : vector<8xf32> to vector<8x1xf32>
    %86 = arith.truncf %83 : vector<8x8xf32> to vector<8x8xbf16>
    %87 = vector.extract_strided_slice %5 {offsets = [0, 24], sizes = [8, 8], strides = [1, 1]} : vector<8x32xbf16> to vector<8x8xbf16>
    %cst_27 = arith.constant dense<0.000000e+00> : vector<8x8xf32>
    %88 = tpu.matmul %86, %87, %cst_27 {dimension_numbers = #tpu.dot_dimension_numbers<[1], [0], [0], [1], [0, 0, 1, 1], [], []>} : vector<8x8xbf16>, vector<8x8xbf16>, vector<8x8xf32> -> vector<8x8xf32>
    %89 = tpu.reciprocal %85 {approx = true} : vector<8x1xf32> -> vector<8x1xf32>
    %90 = vector.broadcast %89 : vector<8x1xf32> to vector<8x8xf32>
    %91 = arith.mulf %88, %90 : vector<8x8xf32>
    %92 = tpu.concatenate %31, %51, %71, %91 in 1 : vector<8x8xf32>, vector<8x8xf32>, vector<8x8xf32>, vector<8x8xf32> -> vector<8x32xf32>
    %93 = arith.truncf %92 : vector<8x32xf32> to vector<8x32xbf16>
    %c0_28 = arith.constant 0 : index
    %c0_29 = arith.constant 0 : index
    %c0_30 = arith.constant 0 : index
    %94 = vector.load %arg4[%c0_28, %c0_29, %c0_30] : memref<1x8x32xbf16, #tpu.memory_space<vmem>>, vector<1x8x32xbf16>
    %95 = vector.shape_cast %94 : vector<1x8x32xbf16> to vector<8x32xbf16>
    %96 = vector.shape_cast %93 : vector<8x32xbf16> to vector<1x8x32xbf16>
    tpu.vector_store %arg4[%c0_28, %c0_29, %c0_30], %96 {strides = array<i32>} : memref<1x8x32xbf16, #tpu.memory_space<vmem>>, vector<1x8x32xbf16>,
    return
  }
  func.func @transform_0(%arg0: i32, %arg1: i32) -> (i32, i32, i32) {
    %c0_i32 = arith.constant 0 : i32
    %c0_i32_0 = arith.constant 0 : i32
    return %arg0, %arg1, %c0_i32 : i32, i32, i32
  }
  func.func @transform_1(%arg0: i32, %arg1: i32) -> (i32, i32, i32) {
    %c0_i32 = arith.constant 0 : i32
    %c0_i32_0 = arith.constant 0 : i32
    %c0_i32_1 = arith.constant 0 : i32
    return %arg0, %c0_i32, %c0_i32_0 : i32, i32, i32
  }
  func.func @transform_2(%arg0: i32, %arg1: i32) -> (i32, i32, i32) {
    %c0_i32 = arith.constant 0 : i32
    %c0_i32_0 = arith.constant 0 : i32
    return %arg0, %arg1, %c0_i32 : i32, i32, i32
  }
}

module attributes {stable_mosaic.version = 11 : i64} {
  func.func @_linear_kernel(%arg0: i32, %arg1: i32, %arg2: i32, %arg3: memref<16x32xbf16, #tpu.memory_space<vmem>>, %arg4: memref<32x32xbf16, #tpu.memory_space<vmem>>, %arg5: memref<1x32xf32, #tpu.memory_space<vmem>>, %arg6: memref<16x32xbf16, #tpu.memory_space<vmem>>, %arg7: memref<16x32xf32, #tpu.memory_space<vmem>>) attributes {dimension_semantics = [#tpu.dimension_semantics<parallel>, #tpu.dimension_semantics<parallel>, #tpu.dimension_semantics<arbitrary>], iteration_bounds = array<i64: 1, 1, 1>, scalar_prefetch = 0 : i64, scratch_operands = 1 : i64, tpu.core_type = #tpu.core_type<tc>, window_params = [{transform_indices = @transform_0, window_bounds = array<i64: 16, 32>}, {transform_indices = @transform_1, window_bounds = array<i64: 32, 32>}, {transform_indices = @transform_2, window_bounds = array<i64: 1, 32>}, {transform_indices = @transform_3, window_bounds = array<i64: 16, 32>}]} {
    %c0_i32 = arith.constant 0 : i32
    %0 = arith.cmpi eq, %arg2, %c0_i32 : i32
    %1 = arith.extui %0 : i1 to i32
    %c0_i32_0 = arith.constant 0 : i32
    %2 = arith.cmpi ne, %1, %c0_i32_0 : i32
    scf.if %2 {
      %cst_10 = arith.constant 0.000000e+00 : f32
      %12 = vector.broadcast %cst_10 : f32 to vector<16x32xf32>
      %c0_11 = arith.constant 0 : index
      %c0_12 = arith.constant 0 : index
      %13 = vector.load %arg7[%c0_11, %c0_12] : memref<16x32xf32, #tpu.memory_space<vmem>>, vector<16x32xf32>
      tpu.vector_store %arg7[%c0_11, %c0_12], %12 {strides = array<i32>} : memref<16x32xf32, #tpu.memory_space<vmem>>, vector<16x32xf32>,
    } else {
    }
    %c0 = arith.constant 0 : index
    %c0_1 = arith.constant 0 : index
    %3 = vector.load %arg7[%c0, %c0_1] : memref<16x32xf32, #tpu.memory_space<vmem>>, vector<16x32xf32>
    %c0_2 = arith.constant 0 : index
    %c0_3 = arith.constant 0 : index
    %4 = vector.load %arg3[%c0_2, %c0_3] : memref<16x32xbf16, #tpu.memory_space<vmem>>, vector<16x32xbf16>
    %c0_4 = arith.constant 0 : index
    %c0_5 = arith.constant 0 : index
    %5 = vector.load %arg4[%c0_4, %c0_5] : memref<32x32xbf16, #tpu.memory_space<vmem>>, vector<32x32xbf16>
    %cst = arith.constant dense<0.000000e+00> : vector<16x32xf32>
    %6 = tpu.matmul %4, %5, %cst {dimension_numbers = #tpu.dot_dimension_numbers<[1], [0], [0], [1], [0, 0, 1, 1], [], []>} : vector<16x32xbf16>, vector<32x32xbf16>, vector<16x32xf32> -> vector<16x32xf32>
    %7 = arith.addf %3, %6 : vector<16x32xf32>
    %c0_6 = arith.constant 0 : index
    %c0_7 = arith.constant 0 : index
    %8 = vector.load %arg7[%c0_6, %c0_7] : memref<16x32xf32, #tpu.memory_space<vmem>>, vector<16x32xf32>
    tpu.vector_store %arg7[%c0_6, %c0_7], %7 {strides = array<i32>} : memref<16x32xf32, #tpu.memory_space<vmem>>, vector<16x32xf32>,
    %c0_i32_8 = arith.constant 0 : i32
    %9 = arith.cmpi eq, %arg2, %c0_i32_8 : i32
    %10 = arith.extui %9 : i1 to i32
    %c0_i32_9 = arith.constant 0 : i32
    %11 = arith.cmpi ne, %10, %c0_i32_9 : i32
    scf.if %11 {
      %c0_10 = arith.constant 0 : index
      %c0_11 = arith.constant 0 : index
      %12 = vector.load %arg7[%c0_10, %c0_11] : memref<16x32xf32, #tpu.memory_space<vmem>>, vector<16x32xf32>
      %c0_12 = arith.constant 0 : index
      %c0_13 = arith.constant 0 : index
      %13 = vector.load %arg5[%c0_12, %c0_13] : memref<1x32xf32, #tpu.memory_space<vmem>>, vector<1x32xf32>
      %14 = vector.broadcast %13 : vector<1x32xf32> to vector<16x32xf32>
      %15 = arith.addf %12, %14 : vector<16x32xf32>
      %16 = arith.truncf %15 : vector<16x32xf32> to vector<16x32xbf16>
      %c0_14 = arith.constant 0 : index
      %c0_15 = arith.constant 0 : index
      %17 = vector.load %arg6[%c0_14, %c0_15] : memref<16x32xbf16, #tpu.memory_space<vmem>>, vector<16x32xbf16>
      tpu.vector_store %arg6[%c0_14, %c0_15], %16 {strides = array<i32>} : memref<16x32xbf16, #tpu.memory_space<vmem>>, vector<16x32xbf16>,
    } else {
    }
    return
  }
  func.func @transform_0(%arg0: i32, %arg1: i32, %arg2: i32) -> (i32, i32) {
    %c0_i32 = arith.constant 0 : i32
    return %arg0, %arg2 : i32, i32
  }
  func.func @transform_1(%arg0: i32, %arg1: i32, %arg2: i32) -> (i32, i32) {
    %c0_i32 = arith.constant 0 : i32
    return %arg2, %arg1 : i32, i32
  }
  func.func @transform_2(%arg0: i32, %arg1: i32, %arg2: i32) -> (i32, i32) {
    %c0_i32 = arith.constant 0 : i32
    %c0_i32_0 = arith.constant 0 : i32
    return %c0_i32, %arg1 : i32, i32
  }
  func.func @transform_3(%arg0: i32, %arg1: i32, %arg2: i32) -> (i32, i32) {
    %c0_i32 = arith.constant 0 : i32
    return %arg0, %arg1 : i32, i32
  }
}

module attributes {stable_mosaic.version = 11 : i64} {
  func.func @_linear_kernel(%arg0: i32, %arg1: i32, %arg2: i32, %arg3: memref<20x32xbf16, #tpu.memory_space<vmem>>, %arg4: memref<32x64xbf16, #tpu.memory_space<vmem>>, %arg5: memref<1x64xf32, #tpu.memory_space<vmem>>, %arg6: memref<20x64xbf16, #tpu.memory_space<vmem>>, %arg7: memref<20x64xf32, #tpu.memory_space<vmem>>) attributes {dimension_semantics = [#tpu.dimension_semantics<parallel>, #tpu.dimension_semantics<parallel>, #tpu.dimension_semantics<arbitrary>], iteration_bounds = array<i64: 1, 1, 1>, scalar_prefetch = 0 : i64, scratch_operands = 1 : i64, tpu.core_type = #tpu.core_type<tc>, window_params = [{transform_indices = @transform_0, window_bounds = array<i64: 20, 32>}, {transform_indices = @transform_1, window_bounds = array<i64: 32, 64>}, {transform_indices = @transform_2, window_bounds = array<i64: 1, 64>}, {transform_indices = @transform_3, window_bounds = array<i64: 20, 64>}]} {
    %c0_i32 = arith.constant 0 : i32
    %0 = arith.cmpi eq, %arg2, %c0_i32 : i32
    %1 = arith.extui %0 : i1 to i32
    %c0_i32_0 = arith.constant 0 : i32
    %2 = arith.cmpi ne, %1, %c0_i32_0 : i32
    scf.if %2 {
      %cst_10 = arith.constant 0.000000e+00 : f32
      %12 = vector.broadcast %cst_10 : f32 to vector<20x64xf32>
      %c0_11 = arith.constant 0 : index
      %c0_12 = arith.constant 0 : index
      %13 = vector.load %arg7[%c0_11, %c0_12] : memref<20x64xf32, #tpu.memory_space<vmem>>, vector<20x64xf32>
      tpu.vector_store %arg7[%c0_11, %c0_12], %12 {strides = array<i32>} : memref<20x64xf32, #tpu.memory_space<vmem>>, vector<20x64xf32>,
    } else {
    }
    %c0 = arith.constant 0 : index
    %c0_1 = arith.constant 0 : index
    %3 = vector.load %arg7[%c0, %c0_1] : memref<20x64xf32, #tpu.memory_space<vmem>>, vector<20x64xf32>
    %c0_2 = arith.constant 0 : index
    %c0_3 = arith.constant 0 : index
    %4 = vector.load %arg3[%c0_2, %c0_3] : memref<20x32xbf16, #tpu.memory_space<vmem>>, vector<20x32xbf16>
    %c0_4 = arith.constant 0 : index
    %c0_5 = arith.constant 0 : index
    %5 = vector.load %arg4[%c0_4, %c0_5] : memref<32x64xbf16, #tpu.memory_space<vmem>>, vector<32x64xbf16>
    %cst = arith.constant dense<0.000000e+00> : vector<20x64xf32>
    %6 = tpu.matmul %4, %5, %cst {dimension_numbers = #tpu.dot_dimension_numbers<[1], [0], [0], [1], [0, 0, 1, 1], [], []>} : vector<20x32xbf16>, vector<32x64xbf16>, vector<20x64xf32> -> vector<20x64xf32>
    %7 = arith.addf %3, %6 : vector<20x64xf32>
    %c0_6 = arith.constant 0 : index
    %c0_7 = arith.constant 0 : index
    %8 = vector.load %arg7[%c0_6, %c0_7] : memref<20x64xf32, #tpu.memory_space<vmem>>, vector<20x64xf32>
    tpu.vector_store %arg7[%c0_6, %c0_7], %7 {strides = array<i32>} : memref<20x64xf32, #tpu.memory_space<vmem>>, vector<20x64xf32>,
    %c0_i32_8 = arith.constant 0 : i32
    %9 = arith.cmpi eq, %arg2, %c0_i32_8 : i32
    %10 = arith.extui %9 : i1 to i32
    %c0_i32_9 = arith.constant 0 : i32
    %11 = arith.cmpi ne, %10, %c0_i32_9 : i32
    scf.if %11 {
      %c0_10 = arith.constant 0 : index
      %c0_11 = arith.constant 0 : index
      %12 = vector.load %arg7[%c0_10, %c0_11] : memref<20x64xf32, #tpu.memory_space<vmem>>, vector<20x64xf32>
      %c0_12 = arith.constant 0 : index
      %c0_13 = arith.constant 0 : index
      %13 = vector.load %arg5[%c0_12, %c0_13] : memref<1x64xf32, #tpu.memory_space<vmem>>, vector<1x64xf32>
      %14 = vector.broadcast %13 : vector<1x64xf32> to vector<20x64xf32>
      %15 = arith.addf %12, %14 : vector<20x64xf32>
      %16 = arith.truncf %15 : vector<20x64xf32> to vector<20x64xbf16>
      %c0_14 = arith.constant 0 : index
      %c0_15 = arith.constant 0 : index
      %17 = vector.load %arg6[%c0_14, %c0_15] : memref<20x64xbf16, #tpu.memory_space<vmem>>, vector<20x64xbf16>
      tpu.vector_store %arg6[%c0_14, %c0_15], %16 {strides = array<i32>} : memref<20x64xbf16, #tpu.memory_space<vmem>>, vector<20x64xbf16>,
    } else {
    }
    return
  }
  func.func @transform_0(%arg0: i32, %arg1: i32, %arg2: i32) -> (i32, i32) {
    %c0_i32 = arith.constant 0 : i32
    return %arg0, %arg2 : i32, i32
  }
  func.func @transform_1(%arg0: i32, %arg1: i32, %arg2: i32) -> (i32, i32) {
    %c0_i32 = arith.constant 0 : i32
    return %arg2, %arg1 : i32, i32
  }
  func.func @transform_2(%arg0: i32, %arg1: i32, %arg2: i32) -> (i32, i32) {
    %c0_i32 = arith.constant 0 : i32
    %c0_i32_0 = arith.constant 0 : i32
    return %c0_i32, %arg1 : i32, i32
  }
  func.func @transform_3(%arg0: i32, %arg1: i32, %arg2: i32) -> (i32, i32) {
    %c0_i32 = arith.constant 0 : i32
    return %arg0, %arg1 : i32, i32
  }
}

module attributes {stable_mosaic.version = 11 : i64} {
  func.func @_attn_kernel(%arg0: i32, %arg1: i32, %arg2: memref<1x8x32xbf16, #tpu.memory_space<vmem>>, %arg3: memref<1x10x64xbf16, #tpu.memory_space<vmem>>, %arg4: memref<1x8x32xbf16, #tpu.memory_space<vmem>>) attributes {dimension_semantics = [#tpu.dimension_semantics<parallel>, #tpu.dimension_semantics<parallel>], iteration_bounds = array<i64: 2, 1>, scalar_prefetch = 0 : i64, scratch_operands = 0 : i64, tpu.core_type = #tpu.core_type<tc>, window_params = [{transform_indices = @transform_0, window_bounds = array<i64: 1, 8, 32>}, {transform_indices = @transform_1, window_bounds = array<i64: 1, 10, 64>}, {transform_indices = @transform_2, window_bounds = array<i64: 1, 8, 32>}]} {
    %c0 = arith.constant 0 : index
    %c0_0 = arith.constant 0 : index
    %c0_1 = arith.constant 0 : index
    %0 = vector.load %arg2[%c0, %c0_0, %c0_1] : memref<1x8x32xbf16, #tpu.memory_space<vmem>>, vector<1x8x32xbf16>
    %1 = vector.shape_cast %0 : vector<1x8x32xbf16> to vector<8x32xbf16>
    %c0_2 = arith.constant 0 : index
    %c0_3 = arith.constant 0 : index
    %c0_4 = arith.constant 0 : index
    %2 = vector.load %arg3[%c0_2, %c0_3, %c0_4] : memref<1x10x64xbf16, #tpu.memory_space<vmem>>, vector<1x10x64xbf16>
    %3 = vector.shape_cast %2 : vector<1x10x64xbf16> to vector<10x64xbf16>
    %4 = vector.extract_strided_slice %3 {offsets = [0, 0], sizes = [10, 32], strides = [1, 1]} : vector<10x64xbf16> to vector<10x32xbf16>
    %5 = vector.extract_strided_slice %3 {offsets = [0, 32], sizes = [10, 32], strides = [1, 1]} : vector<10x64xbf16> to vector<10x32xbf16>
    %6 = vector.extract_strided_slice %1 {offsets = [0, 0], sizes = [8, 8], strides = [1, 1]} : vector<8x32xbf16> to vector<8x8xbf16>
    %7 = vector.extract_strided_slice %4 {offsets = [0, 0], sizes = [10, 8], strides = [1, 1]} : vector<10x32xbf16> to vector<10x8xbf16>
    %cst = arith.constant dense<0.000000e+00> : vector<8x10xf32>
    %8 = tpu.matmul %6, %7, %cst {dimension_numbers = #tpu.dot_dimension_numbers<[1], [1], [0], [0], [0, 0, 1, 0], [], []>} : vector<8x8xbf16>, vector<10x8xbf16>, vector<8x10xf32> -> vector<8x10xf32>
    %cst_5 = arith.constant 0.353553385 : f32
    %9 = vector.broadcast %cst_5 : f32 to vector<8x10xf32>
    %10 = arith.mulf %8, %9 : vector<8x10xf32>
    %cst_6 = arith.constant dense<0xFF800000> : vector<8xf32>
    %11 = vector.multi_reduction <maximumf>, %10, %cst_6 [1] : vector<8x10xf32> to vector<8xf32>
    %12 = vector.shape_cast %11 : vector<8xf32> to vector<8x1xf32>
    %13 = vector.broadcast %12 : vector<8x1xf32> to vector<8x10xf32>
    %14 = arith.subf %10, %13 : vector<8x10xf32>
    %15 = math.exp %14 : vector<8x10xf32>
    %cst_7 = arith.constant dense<0.000000e+00> : vector<8xf32>
    %16 = vector.multi_reduction <add>, %15, %cst_7 [1] : vector<8x10xf32> to vector<8xf32>
    %17 = vector.shape_cast %16 : vector<8xf32> to vector<8x1xf32>
    %18 = arith.truncf %15 : vector<8x10xf32> to vector<8x10xbf16>
    %19 = vector.extract_strided_slice %5 {offsets = [0, 0], sizes = [10, 8], strides = [1, 1]} : vector<10x32xbf16> to vector<10x8xbf16>
    %cst_8 = arith.constant dense<0.000000e+00> : vector<8x8xf32>
    %20 = tpu.matmul %18, %19, %cst_8 {dimension_numbers = #tpu.dot_dimension_numbers<[1], [0], [0], [1], [0, 0, 1, 1], [], []>} : vector<8x10xbf16>, vector<10x8xbf16>, vector<8x8xf32> -> vector<8x8xf32>
    %21 = tpu.reciprocal %17 {approx = true} : vector<8x1xf32> -> vector<8x1xf32>
    %22 = vector.broadcast %21 : vector<8x1xf32> to vector<8x8xf32>
    %23 = arith.mulf %20, %22 : vector<8x8xf32>
    %24 = vector.extract_strided_slice %1 {offsets = [0, 8], sizes = [8, 8], strides = [1, 1]} : vector<8x32xbf16> to vector<8x8xbf16>
    %25 = vector.extract_strided_slice %4 {offsets = [0, 8], sizes = [10, 8], strides = [1, 1]} : vector<10x32xbf16> to vector<10x8xbf16>
    %cst_9 = arith.constant dense<0.000000e+00> : vector<8x10xf32>
    %26 = tpu.matmul %24, %25, %cst_9 {dimension_numbers = #tpu.dot_dimension_numbers<[1], [1], [0], [0], [0, 0, 1, 0], [], []>} : vector<8x8xbf16>, vector<10x8xbf16>, vector<8x10xf32> -> vector<8x10xf32>
    %cst_10 = arith.constant 0.353553385 : f32
    %27 = vector.broadcast %cst_10 : f32 to vector<8x10xf32>
    %28 = arith.mulf %26, %27 : vector<8x10xf32>
    %cst_11 = arith.constant dense<0xFF800000> : vector<8xf32>
    %29 = vector.multi_reduction <maximumf>, %28, %cst_11 [1] : vector<8x10xf32> to vector<8xf32>
    %30 = vector.shape_cast %29 : vector<8xf32> to vector<8x1xf32>
    %31 = vector.broadcast %30 : vector<8x1xf32> to vector<8x10xf32>
    %32 = arith.subf %28, %31 : vector<8x10xf32>
    %33 = math.exp %32 : vector<8x10xf32>
    %cst_12 = arith.constant dense<0.000000e+00> : vector<8xf32>
    %34 = vector.multi_reduction <add>, %33, %cst_12 [1] : vector<8x10xf32> to vector<8xf32>
    %35 = vector.shape_cast %34 : vector<8xf32> to vector<8x1xf32>
    %36 = arith.truncf %33 : vector<8x10xf32> to vector<8x10xbf16>
    %37 = vector.extract_strided_slice %5 {offsets = [0, 8], sizes = [10, 8], strides = [1, 1]} : vector<10x32xbf16> to vector<10x8xbf16>
    %cst_13 = arith.constant dense<0.000000e+00> : vector<8x8xf32>
    %38 = tpu.matmul %36, %37, %cst_13 {dimension_numbers = #tpu.dot_dimension_numbers<[1], [0], [0], [1], [0, 0, 1, 1], [], []>} : vector<8x10xbf16>, vector<10x8xbf16>, vector<8x8xf32> -> vector<8x8xf32>
    %39 = tpu.reciprocal %35 {approx = true} : vector<8x1xf32> -> vector<8x1xf32>
    %40 = vector.broadcast %39 : vector<8x1xf32> to vector<8x8xf32>
    %41 = arith.mulf %38, %40 : vector<8x8xf32>
    %42 = vector.extract_strided_slice %1 {offsets = [0, 16], sizes = [8, 8], strides = [1, 1]} : vector<8x32xbf16> to vector<8x8xbf16>
    %43 = vector.extract_strided_slice %4 {offsets = [0, 16], sizes = [10, 8], strides = [1, 1]} : vector<10x32xbf16> to vector<10x8xbf16>
    %cst_14 = arith.constant dense<0.000000e+00> : vector<8x10xf32>
    %44 = tpu.matmul %42, %43, %cst_14 {dimension_numbers = #tpu.dot_dimension_numbers<[1], [1], [0], [0], [0, 0, 1, 0], [], []>} : vector<8x8xbf16>, vector<10x8xbf16>, vector<8x10xf32> -> vector<8x10xf32>
    %cst_15 = arith.constant 0.353553385 : f32
    %45 = vector.broadcast %cst_15 : f32 to vector<8x10xf32>
    %46 = arith.mulf %44, %45 : vector<8x10xf32>
    %cst_16 = arith.constant dense<0xFF800000> : vector<8xf32>
    %47 = vector.multi_reduction <maximumf>, %46, %cst_16 [1] : vector<8x10xf32> to vector<8xf32>
    %48 = vector.shape_cast %47 : vector<8xf32> to vector<8x1xf32>
    %49 = vector.broadcast %48 : vector<8x1xf32> to vector<8x10xf32>
    %50 = arith.subf %46, %49 : vector<8x10xf32>
    %51 = math.exp %50 : vector<8x10xf32>
    %cst_17 = arith.constant dense<0.000000e+00> : vector<8xf32>
    %52 = vector.multi_reduction <add>, %51, %cst_17 [1] : vector<8x10xf32> to vector<8xf32>
    %53 = vector.shape_cast %52 : vector<8xf32> to vector<8x1xf32>
    %54 = arith.truncf %51 : vector<8x10xf32> to vector<8x10xbf16>
    %55 = vector.extract_strided_slice %5 {offsets = [0, 16], sizes = [10, 8], strides = [1, 1]} : vector<10x32xbf16> to vector<10x8xbf16>
    %cst_18 = arith.constant dense<0.000000e+00> : vector<8x8xf32>
    %56 = tpu.matmul %54, %55, %cst_18 {dimension_numbers = #tpu.dot_dimension_numbers<[1], [0], [0], [1], [0, 0, 1, 1], [], []>} : vector<8x10xbf16>, vector<10x8xbf16>, vector<8x8xf32> -> vector<8x8xf32>
    %57 = tpu.reciprocal %53 {approx = true} : vector<8x1xf32> -> vector<8x1xf32>
    %58 = vector.broadcast %57 : vector<8x1xf32> to vector<8x8xf32>
    %59 = arith.mulf %56, %58 : vector<8x8xf32>
    %60 = vector.extract_strided_slice %1 {offsets = [0, 24], sizes = [8, 8], strides = [1, 1]} : vector<8x32xbf16> to vector<8x8xbf16>
    %61 = vector.extract_strided_slice %4 {offsets = [0, 24], sizes = [10, 8], strides = [1, 1]} : vector<10x32xbf16> to vector<10x8xbf16>
    %cst_19 = arith.constant dense<0.000000e+00> : vector<8x10xf32>
    %62 = tpu.matmul %60, %61, %cst_19 {dimension_numbers = #tpu.dot_dimension_numbers<[1], [1], [0], [0], [0, 0, 1, 0], [], []>} : vector<8x8xbf16>, vector<10x8xbf16>, vector<8x10xf32> -> vector<8x10xf32>
    %cst_20 = arith.constant 0.353553385 : f32
    %63 = vector.broadcast %cst_20 : f32 to vector<8x10xf32>
    %64 = arith.mulf %62, %63 : vector<8x10xf32>
    %cst_21 = arith.constant dense<0xFF800000> : vector<8xf32>
    %65 = vector.multi_reduction <maximumf>, %64, %cst_21 [1] : vector<8x10xf32> to vector<8xf32>
    %66 = vector.shape_cast %65 : vector<8xf32> to vector<8x1xf32>
    %67 = vector.broadcast %66 : vector<8x1xf32> to vector<8x10xf32>
    %68 = arith.subf %64, %67 : vector<8x10xf32>
    %69 = math.exp %68 : vector<8x10xf32>
    %cst_22 = arith.constant dense<0.000000e+00> : vector<8xf32>
    %70 = vector.multi_reduction <add>, %69, %cst_22 [1] : vector<8x10xf32> to vector<8xf32>
    %71 = vector.shape_cast %70 : vector<8xf32> to vector<8x1xf32>
    %72 = arith.truncf %69 : vector<8x10xf32> to vector<8x10xbf16>
    %73 = vector.extract_strided_slice %5 {offsets = [0, 24], sizes = [10, 8], strides = [1, 1]} : vector<10x32xbf16> to vector<10x8xbf16>
    %cst_23 = arith.constant dense<0.000000e+00> : vector<8x8xf32>
    %74 = tpu.matmul %72, %73, %cst_23 {dimension_numbers = #tpu.dot_dimension_numbers<[1], [0], [0], [1], [0, 0, 1, 1], [], []>} : vector<8x10xbf16>, vector<10x8xbf16>, vector<8x8xf32> -> vector<8x8xf32>
    %75 = tpu.reciprocal %71 {approx = true} : vector<8x1xf32> -> vector<8x1xf32>
    %76 = vector.broadcast %75 : vector<8x1xf32> to vector<8x8xf32>
    %77 = arith.mulf %74, %76 : vector<8x8xf32>
    %78 = tpu.concatenate %23, %41, %59, %77 in 1 : vector<8x8xf32>, vector<8x8xf32>, vector<8x8xf32>, vector<8x8xf32> -> vector<8x32xf32>
    %79 = arith.truncf %78 : vector<8x32xf32> to vector<8x32xbf16>
    %c0_24 = arith.constant 0 : index
    %c0_25 = arith.constant 0 : index
    %c0_26 = arith.constant 0 : index
    %80 = vector.load %arg4[%c0_24, %c0_25, %c0_26] : memref<1x8x32xbf16, #tpu.memory_space<vmem>>, vector<1x8x32xbf16>
    %81 = vector.shape_cast %80 : vector<1x8x32xbf16> to vector<8x32xbf16>
    %82 = vector.shape_cast %79 : vector<8x32xbf16> to vector<1x8x32xbf16>
    tpu.vector_store %arg4[%c0_24, %c0_25, %c0_26], %82 {strides = array<i32>} : memref<1x8x32xbf16, #tpu.memory_space<vmem>>, vector<1x8x32xbf16>,
    return
  }
  func.func @transform_0(%arg0: i32, %arg1: i32) -> (i32, i32, i32) {
    %c0_i32 = arith.constant 0 : i32
    %c0_i32_0 = arith.constant 0 : i32
    return %arg0, %arg1, %c0_i32 : i32, i32, i32
  }
  func.func @transform_1(%arg0: i32, %arg1: i32) -> (i32, i32, i32) {
    %c0_i32 = arith.constant 0 : i32
    %c0_i32_0 = arith.constant 0 : i32
    %c0_i32_1 = arith.constant 0 : i32
    return %arg0, %c0_i32, %c0_i32_0 : i32, i32, i32
  }
  func.func @transform_2(%arg0: i32, %arg1: i32) -> (i32, i32, i32) {
    %c0_i32 = arith.constant 0 : i32
    %c0_i32_0 = arith.constant 0 : i32
    return %arg0, %arg1, %c0_i32 : i32, i32, i32
  }
}

module attributes {stable_mosaic.version = 11 : i64} {
  func.func @_linear_kernel(%arg0: i32, %arg1: i32, %arg2: i32, %arg3: memref<16x32xbf16, #tpu.memory_space<vmem>>, %arg4: memref<32x128xbf16, #tpu.memory_space<vmem>>, %arg5: memref<1x128xf32, #tpu.memory_space<vmem>>, %arg6: memref<16x128xf32, #tpu.memory_space<vmem>>, %arg7: memref<16x128xf32, #tpu.memory_space<vmem>>) attributes {dimension_semantics = [#tpu.dimension_semantics<parallel>, #tpu.dimension_semantics<parallel>, #tpu.dimension_semantics<arbitrary>], iteration_bounds = array<i64: 1, 1, 1>, scalar_prefetch = 0 : i64, scratch_operands = 1 : i64, tpu.core_type = #tpu.core_type<tc>, window_params = [{transform_indices = @transform_0, window_bounds = array<i64: 16, 32>}, {transform_indices = @transform_1, window_bounds = array<i64: 32, 128>}, {transform_indices = @transform_2, window_bounds = array<i64: 1, 128>}, {transform_indices = @transform_3, window_bounds = array<i64: 16, 128>}]} {
    %c0_i32 = arith.constant 0 : i32
    %0 = arith.cmpi eq, %arg2, %c0_i32 : i32
    %1 = arith.extui %0 : i1 to i32
    %c0_i32_0 = arith.constant 0 : i32
    %2 = arith.cmpi ne, %1, %c0_i32_0 : i32
    scf.if %2 {
      %cst_10 = arith.constant 0.000000e+00 : f32
      %12 = vector.broadcast %cst_10 : f32 to vector<16x128xf32>
      %c0_11 = arith.constant 0 : index
      %c0_12 = arith.constant 0 : index
      %13 = vector.load %arg7[%c0_11, %c0_12] : memref<16x128xf32, #tpu.memory_space<vmem>>, vector<16x128xf32>
      tpu.vector_store %arg7[%c0_11, %c0_12], %12 {strides = array<i32>} : memref<16x128xf32, #tpu.memory_space<vmem>>, vector<16x128xf32>,
    } else {
    }
    %c0 = arith.constant 0 : index
    %c0_1 = arith.constant 0 : index
    %3 = vector.load %arg7[%c0, %c0_1] : memref<16x128xf32, #tpu.memory_space<vmem>>, vector<16x128xf32>
    %c0_2 = arith.constant 0 : index
    %c0_3 = arith.constant 0 : index
    %4 = vector.load %arg3[%c0_2, %c0_3] : memref<16x32xbf16, #tpu.memory_space<vmem>>, vector<16x32xbf16>
    %c0_4 = arith.constant 0 : index
    %c0_5 = arith.constant 0 : index
    %5 = vector.load %arg4[%c0_4, %c0_5] : memref<32x128xbf16, #tpu.memory_space<vmem>>, vector<32x128xbf16>
    %cst = arith.constant dense<0.000000e+00> : vector<16x128xf32>
    %6 = tpu.matmul %4, %5, %cst {dimension_numbers = #tpu.dot_dimension_numbers<[1], [0], [0], [1], [0, 0, 1, 1], [], []>} : vector<16x32xbf16>, vector<32x128xbf16>, vector<16x128xf32> -> vector<16x128xf32>
    %7 = arith.addf %3, %6 : vector<16x128xf32>
    %c0_6 = arith.constant 0 : index
    %c0_7 = arith.constant 0 : index
    %8 = vector.load %arg7[%c0_6, %c0_7] : memref<16x128xf32, #tpu.memory_space<vmem>>, vector<16x128xf32>
    tpu.vector_store %arg7[%c0_6, %c0_7], %7 {strides = array<i32>} : memref<16x128xf32, #tpu.memory_space<vmem>>, vector<16x128xf32>,
    %c0_i32_8 = arith.constant 0 : i32
    %9 = arith.cmpi eq, %arg2, %c0_i32_8 : i32
    %10 = arith.extui %9 : i1 to i32
    %c0_i32_9 = arith.constant 0 : i32
    %11 = arith.cmpi ne, %10, %c0_i32_9 : i32
    scf.if %11 {
      %c0_10 = arith.constant 0 : index
      %c0_11 = arith.constant 0 : index
      %12 = vector.load %arg7[%c0_10, %c0_11] : memref<16x128xf32, #tpu.memory_space<vmem>>, vector<16x128xf32>
      %c0_12 = arith.constant 0 : index
      %c0_13 = arith.constant 0 : index
      %13 = vector.load %arg5[%c0_12, %c0_13] : memref<1x128xf32, #tpu.memory_space<vmem>>, vector<1x128xf32>
      %14 = vector.broadcast %13 : vector<1x128xf32> to vector<16x128xf32>
      %15 = arith.addf %12, %14 : vector<16x128xf32>
      %c0_14 = arith.constant 0 : index
      %c0_15 = arith.constant 0 : index
      %16 = vector.load %arg6[%c0_14, %c0_15] : memref<16x128xf32, #tpu.memory_space<vmem>>, vector<16x128xf32>
      tpu.vector_store %arg6[%c0_14, %c0_15], %15 {strides = array<i32>} : memref<16x128xf32, #tpu.memory_space<vmem>>, vector<16x128xf32>,
    } else {
    }
    return
  }
  func.func @transform_0(%arg0: i32, %arg1: i32, %arg2: i32) -> (i32, i32) {
    %c0_i32 = arith.constant 0 : i32
    return %arg0, %arg2 : i32, i32
  }
  func.func @transform_1(%arg0: i32, %arg1: i32, %arg2: i32) -> (i32, i32) {
    %c0_i32 = arith.constant 0 : i32
    return %arg2, %arg1 : i32, i32
  }
  func.func @transform_2(%arg0: i32, %arg1: i32, %arg2: i32) -> (i32, i32) {
    %c0_i32 = arith.constant 0 : i32
    %c0_i32_0 = arith.constant 0 : i32
    return %c0_i32, %arg1 : i32, i32
  }
  func.func @transform_3(%arg0: i32, %arg1: i32, %arg2: i32) -> (i32, i32) {
    %c0_i32 = arith.constant 0 : i32
    return %arg0, %arg1 : i32, i32
  }
}

module attributes {stable_mosaic.version = 11 : i64} {
  func.func @_ffn_add_ln_kernel(%arg0: i32, %arg1: memref<16x32xbf16, #tpu.memory_space<vmem>>, %arg2: memref<32x64xbf16, #tpu.memory_space<vmem>>, %arg3: memref<1x64xf32, #tpu.memory_space<vmem>>, %arg4: memref<64x32xbf16, #tpu.memory_space<vmem>>, %arg5: memref<1x32xf32, #tpu.memory_space<vmem>>, %arg6: memref<1x32xf32, #tpu.memory_space<vmem>>, %arg7: memref<1x32xf32, #tpu.memory_space<vmem>>, %arg8: memref<16x32xbf16, #tpu.memory_space<vmem>>) attributes {dimension_semantics = [#tpu.dimension_semantics<parallel>], iteration_bounds = array<i64: 1>, scalar_prefetch = 0 : i64, scratch_operands = 0 : i64, tpu.core_type = #tpu.core_type<tc>, window_params = [{transform_indices = @transform_0, window_bounds = array<i64: 16, 32>}, {pipeline_mode = #tpu.pipeline_mode<synchronous>, transform_indices = @transform_1, window_bounds = array<i64: 32, 64>}, {pipeline_mode = #tpu.pipeline_mode<synchronous>, transform_indices = @transform_2, window_bounds = array<i64: 1, 64>}, {pipeline_mode = #tpu.pipeline_mode<synchronous>, transform_indices = @transform_3, window_bounds = array<i64: 64, 32>}, {pipeline_mode = #tpu.pipeline_mode<synchronous>, transform_indices = @transform_4, window_bounds = array<i64: 1, 32>}, {pipeline_mode = #tpu.pipeline_mode<synchronous>, transform_indices = @transform_5, window_bounds = array<i64: 1, 32>}, {pipeline_mode = #tpu.pipeline_mode<synchronous>, transform_indices = @transform_6, window_bounds = array<i64: 1, 32>}, {transform_indices = @transform_7, window_bounds = array<i64: 16, 32>}]} {
    %c0 = arith.constant 0 : index
    %c0_0 = arith.constant 0 : index
    %0 = vector.load %arg1[%c0, %c0_0] : memref<16x32xbf16, #tpu.memory_space<vmem>>, vector<16x32xbf16>
    %c0_1 = arith.constant 0 : index
    %c0_2 = arith.constant 0 : index
    %1 = vector.load %arg2[%c0_1, %c0_2] : memref<32x64xbf16, #tpu.memory_space<vmem>>, vector<32x64xbf16>
    %cst = arith.constant dense<0.000000e+00> : vector<16x64xf32>
    %2 = tpu.matmul %0, %1, %cst {dimension_numbers = #tpu.dot_dimension_numbers<[1], [0], [0], [1], [0, 0, 1, 1], [], []>} : vector<16x32xbf16>, vector<32x64xbf16>, vector<16x64xf32> -> vector<16x64xf32>
    %c0_3 = arith.constant 0 : index
    %c0_4 = arith.constant 0 : index
    %3 = vector.load %arg3[%c0_3, %c0_4] : memref<1x64xf32, #tpu.memory_space<vmem>>, vector<1x64xf32>
    %4 = vector.broadcast %3 : vector<1x64xf32> to vector<16x64xf32>
    %5 = arith.addf %2, %4 : vector<16x64xf32>
    %cst_5 = arith.constant 0.000000e+00 : f32
    %6 = vector.broadcast %cst_5 : f32 to vector<16x64xf32>
    %7 = arith.maximumf %5, %6 : vector<16x64xf32>
    %8 = arith.truncf %7 : vector<16x64xf32> to vector<16x64xbf16>
    %c0_6 = arith.constant 0 : index
    %c0_7 = arith.constant 0 : index
    %9 = vector.load %arg4[%c0_6, %c0_7] : memref<64x32xbf16, #tpu.memory_space<vmem>>, vector<64x32xbf16>
    %cst_8 = arith.constant dense<0.000000e+00> : vector<16x32xf32>
    %10 = tpu.matmul %8, %9, %cst_8 {dimension_numbers = #tpu.dot_dimension_numbers<[1], [0], [0], [1], [0, 0, 1, 1], [], []>} : vector<16x64xbf16>, vector<64x32xbf16>, vector<16x32xf32> -> vector<16x32xf32>
    %c0_9 = arith.constant 0 : index
    %c0_10 = arith.constant 0 : index
    %11 = vector.load %arg5[%c0_9, %c0_10] : memref<1x32xf32, #tpu.memory_space<vmem>>, vector<1x32xf32>
    %12 = vector.broadcast %11 : vector<1x32xf32> to vector<16x32xf32>
    %13 = arith.addf %10, %12 : vector<16x32xf32>
    %14 = arith.extf %0 : vector<16x32xbf16> to vector<16x32xf32>
    %15 = arith.addf %13, %14 : vector<16x32xf32>
    %cst_11 = arith.constant dense<0.000000e+00> : vector<16xf32>
    %16 = vector.multi_reduction <add>, %15, %cst_11 [1] : vector<16x32xf32> to vector<16xf32>
    %17 = vector.shape_cast %16 : vector<16xf32> to vector<16x1xf32>
    %cst_12 = arith.constant 3.200000e+01 : f32
    %18 = vector.broadcast %cst_12 : f32 to vector<16x1xf32>
    %19 = arith.divf %17, %18 : vector<16x1xf32>
    %20 = vector.broadcast %19 : vector<16x1xf32> to vector<16x32xf32>
    %21 = arith.subf %15, %20 : vector<16x32xf32>
    %22 = arith.mulf %21, %21 : vector<16x32xf32>
    %cst_13 = arith.constant dense<0.000000e+00> : vector<16xf32>
    %23 = vector.multi_reduction <add>, %22, %cst_13 [1] : vector<16x32xf32> to vector<16xf32>
    %24 = vector.shape_cast %23 : vector<16xf32> to vector<16x1xf32>
    %cst_14 = arith.constant 3.200000e+01 : f32
    %25 = vector.broadcast %cst_14 : f32 to vector<16x1xf32>
    %26 = arith.divf %24, %25 : vector<16x1xf32>
    %27 = vector.broadcast %19 : vector<16x1xf32> to vector<16x32xf32>
    %28 = arith.subf %15, %27 : vector<16x32xf32>
    %cst_15 = arith.constant 9.99999974E-6 : f32
    %29 = vector.broadcast %cst_15 : f32 to vector<16x1xf32>
    %30 = arith.addf %26, %29 : vector<16x1xf32>
    %31 = math.rsqrt %30 : vector<16x1xf32>
    %32 = vector.broadcast %31 : vector<16x1xf32> to vector<16x32xf32>
    %33 = arith.mulf %28, %32 : vector<16x32xf32>
    %c0_16 = arith.constant 0 : index
    %c0_17 = arith.constant 0 : index
    %34 = vector.load %arg6[%c0_16, %c0_17] : memref<1x32xf32, #tpu.memory_space<vmem>>, vector<1x32xf32>
    %35 = vector.broadcast %34 : vector<1x32xf32> to vector<16x32xf32>
    %36 = arith.mulf %33, %35 : vector<16x32xf32>
    %c0_18 = arith.constant 0 : index
    %c0_19 = arith.constant 0 : index
    %37 = vector.load %arg7[%c0_18, %c0_19] : memref<1x32xf32, #tpu.memory_space<vmem>>, vector<1x32xf32>
    %38 = vector.broadcast %37 : vector<1x32xf32> to vector<16x32xf32>
    %39 = arith.addf %36, %38 : vector<16x32xf32>
    %40 = arith.truncf %39 : vector<16x32xf32> to vector<16x32xbf16>
    %c0_20 = arith.constant 0 : index
    %c0_21 = arith.constant 0 : index
    %41 = vector.load %arg8[%c0_20, %c0_21] : memref<16x32xbf16, #tpu.memory_space<vmem>>, vector<16x32xbf16>
    tpu.vector_store %arg8[%c0_20, %c0_21], %40 {strides = array<i32>} : memref<16x32xbf16, #tpu.memory_space<vmem>>, vector<16x32xbf16>,
    return
  }
  func.func @transform_0(%arg0: i32) -> (i32, i32) {
    %c0_i32 = arith.constant 0 : i32
    %c0_i32_0 = arith.constant 0 : i32
    return %arg0, %c0_i32 : i32, i32
  }
  func.func @transform_1(%arg0: i32) -> (i32, i32) {
    %c0_i32 = arith.constant 0 : i32
    %c0_i32_0 = arith.constant 0 : i32
    %c0_i32_1 = arith.constant 0 : i32
    return %c0_i32, %c0_i32_0 : i32, i32
  }
  func.func @transform_2(%arg0: i32) -> (i32, i32) {
    %c0_i32 = arith.constant 0 : i32
    %c0_i32_0 = arith.constant 0 : i32
    %c0_i32_1 = arith.constant 0 : i32
    return %c0_i32, %c0_i32_0 : i32, i32
  }
  func.func @transform_3(%arg0: i32) -> (i32, i32) {
    %c0_i32 = arith.constant 0 : i32
    %c0_i32_0 = arith.constant 0 : i32
    %c0_i32_1 = arith.constant 0 : i32
    return %c0_i32, %c0_i32_0 : i32, i32
  }
  func.func @transform_4(%arg0: i32) -> (i32, i32) {
    %c0_i32 = arith.constant 0 : i32
    %c0_i32_0 = arith.constant 0 : i32
    %c0_i32_1 = arith.constant 0 : i32
    return %c0_i32, %c0_i32_0 : i32, i32
  }
  func.func @transform_5(%arg0: i32) -> (i32, i32) {
    %c0_i32 = arith.constant 0 : i32
    %c0_i32_0 = arith.constant 0 : i32
    %c0_i32_1 = arith.constant 0 : i32
    return %c0_i32, %c0_i32_0 : i32, i32
  }
  func.func @transform_6(%arg0: i32) -> (i32, i32) {
    %c0_i32 = arith.constant 0 : i32
    %c0_i32_0 = arith.constant 0 : i32
    %c0_i32_1 = arith.constant 0 : i32
    return %c0_i32, %c0_i32_0 : i32, i32
  }
  func.func @transform_7(%arg0: i32) -> (i32, i32) {
    %c0_i32 = arith.constant 0 : i32
    %c0_i32_0 = arith.constant 0 : i32
    return %arg0, %c0_i32 : i32, i32
  }
}

</mosaic_0001>

<bundles_post_ra>
// kernel: transformer_decoder_forward.19
= control target key start
LH: loop header
LB: loop body
LE: loop exit
PB: predicated region body
PF: predicated region fallthrough
CT: control target
= control target key end

     0   :  { %v200_v0 = vmov 0.0   ;;  %vm201_vm0 = vmmov 0   ;;  %vm54_vm1 = vcmask 261120   ;;  %vm158_vm2 = vcmask 257024   ;;  %s269_s1 = inlined_call_operand.vmem [shape: bf16[32,32], index: 1, kind: input, shape index: {}]   ;;  %s270_s0 = inlined_call_operand.vmem [shape: bf16[16,32], index: 0, kind: input, shape index: {}]   ;;  %s271_s3 = inlined_call_operand.vmem [shape: bf16[16,32], index: 3, kind: input, shape index: {}]   ;;  %s272_s2 = inlined_call_operand.vmem [shape: f32[1,32], index: 2, kind: input, shape index: {}]   ;;  %s273_s4 = inlined_call_operand.vmem [shape: f32[1,32], index: 4, kind: input, shape index: {}]   ;;  %s274_s5 = inlined_call_operand.vmem [shape: f32[1,32], index: 5, kind: input, shape index: {}]   ;;  %s275_s6 = inlined_call_operand.vmem [shape: bf16[16,32], index: 6, kind: output, shape index: {}]  }
   0x1   :  { %183 = vmatprep.subr.bf16.mxu0 %v200_v0  ;;  %v193_v1 = vld [vmem:[%s269_s1] sm:$0xff]   ;;  %187 = vmatprep.mubr.msk.bf16.mxu0 %vm201_vm0, %v200_v0  ;;  %v194_v2 = vld [vmem:[%s269_s1 + $0x8] sm:$0xff]  }
   0x2   :  { %184 = vmatpush3.bf16.msra.mxu0 %v193_v1  ;;  %v195_v3 = vld [vmem:[%s270_s0] sm:$0xff]  }
   0x3   :  { %185 = vmatprep.subr.bf16.mxu0 %v200_v0  ;;  %v177_v4 = vld [vmem:[%s271_s3] sm:$0xff]  }
   0x4   :  { %v165_v5 = vld [vmem:[%s272_s2] ss:$0 sm:$0xff]  ;;  %v178_v6 = vunpack.c.l.bf16 %v177_v4  ;;  %v179_v10 = vunpack.c.h.bf16 %v177_v4 }
   0x5   :  { %v170_v35 = vld [vmem:[%s273_s4] ss:$0 sm:$0xff] }
   0x6   :  { %186 = vmatpush3.bf16.msra.mxu0 %v194_v2  ;;  %v171_v37 = vld [vmem:[%s274_s5] ss:$0 sm:$0xff] }
   0x9   :  { %188 = vmatmul.mubr.msk.bf16.vlgmr.msra.gmra.mrb[0].mxu0 %vm54_vm1, %v195_v3 }
  0xdc   :  { %v92_v7 = vpop.f32.mrb[0].mxu0 }
  0xdd   :  { %v93_v8 = vadd.f32 %v165_v5, %v92_v7  ;;  %v189_v9 = vpop.f32.mrb[1].mxu0 }
  0xde   :  { %v95_v11 = vpop.f32.mrb[2].mxu0 }
  0xdf   :  { %v96_v12 = vadd.f32 %v165_v5, %v95_v11  ;;  %v190_v13 = vpop.f32.mrb[3].mxu0  ;;  %v103_v14 = vadd.f32 %v178_v6, %v93_v8 }
  0xe1   :  { %v105_v15 = vsel %vm54_vm1, %v103_v14, 0.0  ;;  %v104_v16 = vadd.f32 %v179_v10, %v96_v12 }
  0xe2   :  { %106 = vadd.xlane.f32.xlu0 %v105_v15 }
  0xe3   :  { %v108_v17 = vsel %vm54_vm1, %v104_v16, 0.0 }
  0xe6   :  { %109 = vadd.xlane.f32.xlu0 %v108_v17 }
 0x16f   :  { %v107_v18 = vpop.xlane.xlu0 %106 }
 0x170   :  { %v112_v19 = vmul.f32 0.03125, %v107_v18 }
 0x172   :  { %v114_v20 = vsub.f32 %v103_v14, %v112_v19 }
 0x173   :  { %v110_v21 = vpop.xlane.xlu0 %109 }
 0x174   :  { %v113_v22 = vmul.f32 0.03125, %v110_v21  ;;  %v116_v23 = vmul.f32 %v114_v20, %v114_v20 }
 0x176   :  { %v115_v24 = vsub.f32 %v104_v16, %v113_v22  ;;  %v118_v25 = vsel %vm54_vm1, %v116_v23, 0.0 }
 0x177   :  { %119 = vadd.xlane.f32.xlu1 %v118_v25 }
 0x178   :  { %v117_v26 = vmul.f32 %v115_v24, %v115_v24 }
 0x17a   :  { %v121_v27 = vsel %vm54_vm1, %v117_v26, 0.0 }
 0x17b   :  { %122 = vadd.xlane.f32.xlu1 %v121_v27 }
 0x204   :  { %v120_v28 = vpop.xlane.xlu1 %119 }
 0x205   :  { %v124_v29 = vmul.f32 0.03125, %v120_v28 }
 0x207   :  { %v126_v30 = vadd.f32 1e-05, %v124_v29 }
 0x208   :  { %v123_v31 = vpop.xlane.xlu1 %122 }
 0x209   :  { %196 = vrsqrt.f32 %v126_v30  ;;  %v125_v32 = vmul.f32 0.03125, %v123_v31 }
 0x20b   :  { %v127_v33 = vadd.f32 1e-05, %v125_v32 }
 0x20d   :  { %198 = vrsqrt.f32 %v127_v33 }
 0x213   :  { %v197_v34 = vpop.eup %196 }
 0x214   :  { %v130_v36 = vmul.f32 %v197_v34, %v114_v20 }
 0x216   :  { %v139_v38 = vmul.f32 %v170_v35, %v130_v36 }
 0x217   :  { %v199_v39 = vpop.eup %198 }
 0x218   :  { %v148_v40 = vadd.f32 %v171_v37, %v139_v38  ;;  %v131_v41 = vmul.f32 %v199_v39, %v115_v24 }
 0x21a   :  { %v174_v42 = vpack.c.bf16 %v148_v40, %v148_v40  ;;  %v140_v43 = vmul.f32 %v170_v35, %v131_v41 }
 0x21c   :  { %159 = vst.msk [vmem:[%s275_s6] sm:$0xf] %vm158_vm2, %v174_v42  ;;  %v149_v44 = vadd.f32 %v171_v37, %v140_v43 }
 0x21e   :  { %v175_v45 = vpack.c.bf16 %v149_v44, %v149_v44 }
 0x220   :  { %160 = vst.msk [vmem:[%s275_s6 + $0x4] sm:$0xf] %vm158_vm2, %v175_v45 }

// kernel: transformer_decoder_forward.17
= control target key start
LH: loop header
LB: loop body
LE: loop exit
PB: predicated region body
PF: predicated region fallthrough
CT: control target
= control target key end

     0   :  { %vm19_vm0 = vcmask 785408   ;;  %v151_v0 = vmov 0.0   ;;  %vm152_vm1 = vmmov 0   ;;  %vm47_vm2 = vcmask 261120   ;;  %s195_s1 = inlined_call_operand.vmem [shape: bf16[32,96], index: 1, kind: input, shape index: {}]   ;;  %s196_s0 = inlined_call_operand.vmem [shape: bf16[16,32], index: 0, kind: input, shape index: {}]   ;;  %s197_s2 = inlined_call_operand.vmem [shape: f32[1,96], index: 2, kind: input, shape index: {}]   ;;  %s198_s3 = inlined_call_operand.vmem [shape: bf16[16,96], index: 3, kind: output, shape index: {}]  }
   0x1   :  { %138 = vmatprep.subr.bf16.mxu0 %v151_v0  ;;  %v148_v1 = vld [vmem:[%s195_s1] sm:$0xff]   ;;  %142 = vmatprep.mubr.msk.bf16.mxu0 %vm152_vm1, %v151_v0  ;;  %20 = vst.msk [vmem:[#allocation2] sm:$0xff] %vm19_vm0, %v151_v0  ;;  %21 = vst.msk [vmem:[#allocation2 + $0x8] sm:$0xff] %vm19_vm0, %v151_v0  ;;  %v149_v2 = vld [vmem:[%s195_s1 + $0x8] sm:$0xff]   ;;  %vm119_vm3 = vcmask 781312  }
   0x2   :  { %139 = vmatpush3.bf16.msra.mxu0 %v148_v1  ;;  %v150_v3 = vld [vmem:[%s196_s0] sm:$0xff]  }
   0x3   :  { %140 = vmatprep.subr.bf16.mxu0 %v151_v0  ;;  %v130_v12 = vld [vmem:[%s197_s2] ss:$0 sm:$0xff] }
   0x6   :  { %141 = vmatpush3.bf16.msra.mxu0 %v149_v2 }
   0x8   :  { %v22_v4 = vld [vmem:[#allocation2] sm:$0xff]  ;;  %v23_v6 = vld [vmem:[#allocation2 + $0x8] sm:$0xff] }
   0x9   :  { %143 = vmatmul.mubr.msk.bf16.vlgmr.msra.gmra.mrb[0].mxu0 %vm47_vm2, %v150_v3 }
  0xdc   :  { %v85_v5 = vpop.f32.mrb[0].mxu0 }
  0xdd   :  { %v92_v7 = vadd.f32 %v85_v5, %v22_v4  ;;  %v144_v8 = vpop.f32.mrb[1].mxu0 }
  0xde   :  { %v88_v9 = vpop.f32.mrb[2].mxu0 }
  0xdf   :  { %95 = vst.msk [vmem:[#allocation2] sm:$0xff] %vm19_vm0, %v92_v7  ;;  %v93_v10 = vadd.f32 %v88_v9, %v23_v6  ;;  %v145_v11 = vpop.f32.mrb[3].mxu0 }
  0xe1   :  { %96 = vst.msk [vmem:[#allocation2 + $0x8] sm:$0xff] %vm19_vm0, %v93_v10 }
  0xe6   :  { %v100_v13 = vld [vmem:[#allocation2] sm:$0xff] }
  0xe7   :  { %v109_v14 = vadd.f32 %v130_v12, %v100_v13 }
  0xe8   :  { %v101_v15 = vld [vmem:[#allocation2 + $0x8] sm:$0xff] }
  0xe9   :  { %v133_v16 = vpack.c.bf16 %v109_v14, %v109_v14  ;;  %v110_v17 = vadd.f32 %v130_v12, %v101_v15 }
  0xeb   :  { %120 = vst.msk [vmem:[%s198_s3] sm:$0xf] %vm119_vm3, %v133_v16  ;;  %v134_v18 = vpack.c.bf16 %v110_v17, %v110_v17 }
  0xed   :  { %121 = vst.msk [vmem:[%s198_s3 + $0x4] sm:$0xf] %vm119_vm3, %v134_v18 }

// kernel: transformer_decoder_forward.20
= control target key start
LH: loop header
LB: loop body
LE: loop exit
PB: predicated region body
PF: predicated region fallthrough
CT: control target
= control target key end

     0   :  { %vm19_vm0 = vcmask 261120   ;;  %v150_v0 = vmov 0.0   ;;  %vm151_vm1 = vmmov 0   ;;  %vm118_vm2 = vcmask 257024   ;;  %s195_s1 = inlined_call_operand.vmem [shape: bf16[32,32], index: 1, kind: input, shape index: {}]   ;;  %s196_s0 = inlined_call_operand.vmem [shape: bf16[16,32], index: 0, kind: input, shape index: {}]   ;;  %s197_s2 = inlined_call_operand.vmem [shape: f32[1,32], index: 2, kind: input, shape index: {}]   ;;  %s198_s3 = inlined_call_operand.vmem [shape: bf16[16,32], index: 3, kind: output, shape index: {}]  }
   0x1   :  { %137 = vmatprep.subr.bf16.mxu0 %v150_v0  ;;  %v147_v1 = vld [vmem:[%s195_s1] sm:$0xff]   ;;  %141 = vmatprep.mubr.msk.bf16.mxu0 %vm151_vm1, %v150_v0  ;;  %20 = vst.msk [vmem:[#allocation2] sm:$0xff] %vm19_vm0, %v150_v0  ;;  %21 = vst.msk [vmem:[#allocation2 + $0x8] sm:$0xff] %vm19_vm0, %v150_v0  ;;  %v148_v2 = vld [vmem:[%s195_s1 + $0x8] sm:$0xff]  }
   0x2   :  { %138 = vmatpush3.bf16.msra.mxu0 %v147_v1  ;;  %v149_v3 = vld [vmem:[%s196_s0] sm:$0xff]  }
   0x3   :  { %139 = vmatprep.subr.bf16.mxu0 %v150_v0  ;;  %v129_v12 = vld [vmem:[%s197_s2] ss:$0 sm:$0xff] }
   0x6   :  { %140 = vmatpush3.bf16.msra.mxu0 %v148_v2 }
   0x8   :  { %v22_v4 = vld [vmem:[#allocation2] sm:$0xff]  ;;  %v23_v6 = vld [vmem:[#allocation2 + $0x8] sm:$0xff] }
   0x9   :  { %142 = vmatmul.mubr.msk.bf16.vlgmr.msra.gmra.mrb[0].mxu0 %vm19_vm0, %v149_v3 }
  0xdc   :  { %v85_v5 = vpop.f32.mrb[0].mxu0 }
  0xdd   :  { %v92_v7 = vadd.f32 %v85_v5, %v22_v4  ;;  %v143_v8 = vpop.f32.mrb[1].mxu0 }
  0xde   :  { %v88_v9 = vpop.f32.mrb[2].mxu0 }
  0xdf   :  { %94 = vst.msk [vmem:[#allocation2] sm:$0xff] %vm19_vm0, %v92_v7  ;;  %v93_v10 = vadd.f32 %v88_v9, %v23_v6  ;;  %v144_v11 = vpop.f32.mrb[3].mxu0 }
  0xe1   :  { %95 = vst.msk [vmem:[#allocation2 + $0x8] sm:$0xff] %vm19_vm0, %v93_v10 }
  0xe6   :  { %v99_v13 = vld [vmem:[#allocation2] sm:$0xff] }
  0xe7   :  { %v108_v14 = vadd.f32 %v129_v12, %v99_v13 }
  0xe8   :  { %v100_v15 = vld [vmem:[#allocation2 + $0x8] sm:$0xff] }
  0xe9   :  { %v132_v16 = vpack.c.bf16 %v108_v14, %v108_v14  ;;  %v109_v17 = vadd.f32 %v129_v12, %v100_v15 }
  0xeb   :  { %119 = vst.msk [vmem:[%s198_s3] sm:$0xf] %vm118_vm2, %v132_v16  ;;  %v133_v18 = vpack.c.bf16 %v109_v17, %v109_v17 }
  0xed   :  { %120 = vst.msk [vmem:[%s198_s3 + $0x4] sm:$0xf] %vm118_vm2, %v133_v18 }

// kernel: transformer_decoder_forward.18
= control target key start
LH: loop header
LB: loop body
LE: loop exit
PB: predicated region body
PF: predicated region fallthrough
CT: control target
= control target key end

     0   :  { %s945_s9 = smov 0   ;;  %s947_s10 = smov 0   ;;  %s1070_s0 = inlined_call_operand.vmem [shape: bf16[2,8,32], index: 0, kind: input, shape index: {}]   ;;  %s1071_s1 = inlined_call_operand.vmem [shape: bf16[2,8,64], index: 1, kind: input, shape index: {}]   ;;  %s1072_s2 = inlined_call_operand.vmem [shape: bf16[2,8,32], index: 2, kind: output, shape index: {}]  }
   0x1   :  { %s949_s11 = smov 0  }
   0x2 LB: > { %s24_s12 = sadd.s32 1, %s912_s10  ;;  %p760_p0 = scmp.ge.s32.totalorder %s916_s11, 1  ;;  %s916_s11 = sphi %s949_s11, %s12_s11   ;;  %s912_s10 = sphi %s947_s10, %s1074_s10   ;;  %s908_s9 = sphi %s945_s9, %s1073_s9  }
   0x3   : > { %p26_p1 = scmp.ge.s32.totalorder %s24_s12, 2  ;;  %p139_p2 = scmp.lt.s32.totalorder %s916_s11, 3 }
   0x5   : > { %s1076_s12 = smov (%p26_p1, %s24_s12), 0  ;;  %p140_p3 = pnand %p760_p0, %p139_p2 }
   0x6   : > { %p169_p4 = scmp.lt.s32.totalorder (!%p140_p3), %s908_s9, 1  ;;  %v918_v0 = vmov (!%p140_p3), 0.0   ;;  %vm919_vm0 = vmmov (!%p140_p3), 0   ;;  %vm198_vm1 = vcmask (!%p140_p3), 64512   ;;  %s920_s20 = smov (!%p140_p3), 120   ;;  %v191_v6 = vlaneseq (!%p140_p3) }
   0x7   : > { %143 = sbr.rel (%p140_p3) target bundleno = 1133 (0x46d), region = 28  ;;  %792 = vmatprep.subr.bf16.mxu0 (!%p140_p3), %v918_v0  ;;  %794 = vmatprep.mubr.msk.bf16.mxu0 (!%p140_p3), %vm919_vm0, %v918_v0  ;;  %s921_s21 = smov (!%p140_p3), 112   ;;  %vm265_vm3 = vcmask (!%p140_p3), 1043456   ;;  %vm663_vm4 = vcmask (!%p140_p3), 130048   ;;  %vm665_vm5 = vcmask (!%p140_p3), 195584   ;;  %vm668_vm6 = vcmask (!%p140_p3), 257024  }
   0x8   : > { %798 = vmatprep.subr.bf16.mxu1 (!%p140_p3), %v918_v0  ;;  %800 = vmatprep.mubr.msk.bf16.mxu1 (!%p140_p3), %vm919_vm0, %v918_v0  ;;  %s922_s22 = smov (!%p140_p3), 104   ;;  %v989_v7 = vshrl.u32 (!%p140_p3), %v191_v6, 7  ;;  %v991_v8 = vand.u32 (!%p140_p3), 127, %v191_v6  ;;  %s923_s23 = smov (!%p140_p3), 96  }
   0x9   : > { %s924_s24 = smov (!%p140_p3), 88   ;;  %s925_s25 = smov (!%p140_p3), 72  }
   0xa   : > { %vm197_vm2 = vcmp.ge.s32.totalorder (!%p140_p3), %v989_v7, %v991_v8  ;;  %s926_s26 = smov (!%p140_p3), 80   ;;  %s927_s27 = smov (!%p140_p3), 8  }
   0xb   : > { %s928_s28 = smov (!%p140_p3), 16   ;;  %s929_s29 = smov (!%p140_p3), 24  }
   0xe   : > { %s1078_s9 = smov (!%p169_p4, %s908_s9), 1 }
   0xf   : > { %s969_s13 = sshll.u32 %s1078_s9, 2 }
  0x10   : > { %s179_s16 = scalar_lea.vmem %s1071_s1, %s969_s13  ;;  %s175_s19 = scalar_lea.vmem %s1070_s0, %s969_s13 }
  0x11   : > { %v189_v1 = vld [vmem:[%s179_s16] sm:$0xf]  ;;  %s186_s4 = scalar_lea.vmem %s1072_s2, %s969_s13 }
  0x12   : > { %v203_v2 = vsel %vm198_vm1, %v189_v1, 0  ;;  %v188_v3 = vld [vmem:[%s175_s19] sm:$0xf]  ;;  %v984_v4 = vcombine.low %v189_v1, %v189_v1 }
  0x13   : > { %793 = vmatpush3.bf16.xpose.msra.mxu0 %v203_v2  ;;  %v767_v5 = vcombine.low %v188_v3, %v188_v3 }
  0x14   : > { %810 = vmatprep.subr.bf16.mxu0 %v918_v0  ;;  %316 = vrot.lane.b32.xlu1 %v984_v4, %s920_s20 }
  0x18   : > { %314 = vrot.lane.b32.xlu1 %v767_v5, %s920_s20 }
  0x1a   : > { %795 = vmatmul.mubr.msk.bf16.vlgmr.msra.gmra.mrb[0].mxu0 %vm198_vm1, %v188_v3 }
  0x1b   : > { %812 = vmatprep.mubr.msk.bf16.mxu0 %vm919_vm0, %v918_v0 }
  0x1c   : > { %428 = vrot.lane.b32.xlu1 %v984_v4, %s921_s21 }
  0x20   : > { %426 = vrot.lane.b32.xlu1 %v767_v5, %s921_s21 }
  0x24   : > { %540 = vrot.lane.b32.xlu1 %v984_v4, %s922_s22 }
  0x28   : > { %538 = vrot.lane.b32.xlu1 %v767_v5, %s922_s22 }
  0x86   : > { %v317_v21 = vpop.permute.xlu1 %316 }
  0x87   : > { %v322_v24 = vsel %vm198_vm1, %v317_v21, 0 }
  0x8a   : > { %v315_v22 = vpop.permute.xlu1 %314 }
  0x8e   : > { %v429_v26 = vpop.permute.xlu1 %428 }
  0x8f   : > { %v434_v28 = vsel %vm198_vm1, %v429_v26, 0 }
  0x92   : > { %v427_v27 = vpop.permute.xlu1 %426 }
  0x96   : > { %v541_v29 = vpop.permute.xlu1 %540 }
  0x97   : > { %v546_v30 = vsel %vm198_vm1, %v541_v29, 0 }
  0x9a   : > { %v539_v31 = vpop.permute.xlu1 %538 }
  0xed   : > { %v239_v9 = vpop.f32.mrb[0].mxu0 }
  0xee   : > { %v245_v10 = vmul.f32 0.35355338, %v239_v9  ;;  %v796_v11 = vpop.f32.mrb[1].mxu0 }
  0xef   : > { %v242_v12 = vpop.f32.mrb[2].mxu0 }
  0xf0   : > { %v797_v13 = vpop.f32.mrb[3].mxu0  ;;  %v246_v14 = vsel %vm197_vm2, %v245_v10, -1e+30 }
  0xf1   : > { %v247_v15 = vsel %vm198_vm1, %v246_v14, -inf }
  0xf2   : > { %248 = vmax.xlane.f32.xlu0 %v247_v15 }
 0x108   : > { %260 = vrot.lane.b32.xlu0 %v984_v4, %s923_s23 }
 0x17f   : > { %v249_v16 = vpop.xlane.xlu0 %248 }
 0x180   : > { %v250_v17 = vsub.f32 %v246_v14, %v249_v16 }
 0x182   : > { %v251_v18 = vmul.f32 1.442695, %v250_v17 }
 0x183   : > { %v261_v19 = vpop.permute.xlu0 %260 }
 0x184   : > { %878 = vpow2.f32 %v251_v18  ;;  %v267_v20 = vsel %vm265_vm3, %v261_v19, 0 }
 0x185   : > { %799 = vmatpush3.bf16.msra.mxu1 %v267_v20 }
 0x186   : > { %804 = vmatprep.subr.bf16.mxu1 %v918_v0 }
 0x18e   : > { %v1002_v23 = vpop.eup %878 }
 0x18f   : > { %v256_v25 = vpack.c.bf16 %v1002_v23, %v1002_v23  ;;  %v253_v9 = vsel %vm198_vm1, %v1002_v23, 0.0 }
 0x191   : > { %801 = vmatmul.mubr.msk.bf16.vlgmr.msra.gmra.mrb[0].mxu1 %vm198_vm1, %v256_v25 }
 0x192   : > { %805 = vmatpush3.bf16.xpose.msra.mxu1 %v322_v24  ;;  %806 = vmatprep.mubr.msk.bf16.mxu1 %vm919_vm0, %v918_v0 }
 0x193   : > { %816 = vmatprep.subr.bf16.mxu1 %v918_v0 }
 0x199   : > { %807 = vmatmul.mubr.msk.bf16.vlgmr.msra.gmra.mrb[4].mxu1 %vm198_vm1, %v315_v22 }
 0x19a   : > { %817 = vmatpush3.bf16.xpose.msra.mxu1 %v434_v28  ;;  %818 = vmatprep.mubr.msk.bf16.mxu1 %vm919_vm0, %v918_v0 }
 0x19b   : > { %828 = vmatprep.subr.bf16.mxu1 %v918_v0 }
 0x1a1   : > { %819 = vmatmul.mubr.msk.bf16.vlgmr.msra.gmra.mrb[8].mxu1 %vm198_vm1, %v427_v27 }
 0x1a2   : > { %829 = vmatpush3.bf16.xpose.msra.mxu1 %v546_v30  ;;  %830 = vmatprep.mubr.msk.bf16.mxu1 %vm919_vm0, %v918_v0 }
 0x1a9   : > { %831 = vmatmul.mubr.msk.bf16.vlgmr.msra.gmra.mrb[12].mxu1 %vm198_vm1, %v539_v31 }
 0x264   : > { %v1021_v32 = vpop.f32.mrb[0].mxu1 }
 0x265   : > { %v802_v33 = vpop.f32.mrb[1].mxu1 }
 0x266   : > { %v306_v34 = vpop.f32.mrb[2].mxu1 }
 0x267   : > { %v803_v35 = vpop.f32.mrb[3].mxu1 }
 0x26c   : > { %v358_v36 = vpop.f32.mrb[4].mxu1 }
 0x26d   : > { %v364_v37 = vmul.f32 0.35355338, %v358_v36  ;;  %v808_v38 = vpop.f32.mrb[5].mxu1 }
 0x26e   : > { %v361_v39 = vpop.f32.mrb[6].mxu1 }
 0x26f   : > { %v809_v40 = vpop.f32.mrb[7].mxu1  ;;  %v365_v41 = vsel %vm197_vm2, %v364_v37, -1e+30 }
 0x270   : > { %v366_v42 = vsel %vm198_vm1, %v365_v41, -inf }
 0x271   : > { %367 = vmax.xlane.f32.xlu1 %v366_v42 }
 0x274   : > { %v470_v43 = vpop.f32.mrb[8].mxu1 }
 0x275   : > { %v476_v44 = vmul.f32 0.35355338, %v470_v43  ;;  %v820_v45 = vpop.f32.mrb[9].mxu1 }
 0x276   : > { %v473_v46 = vpop.f32.mrb[10].mxu1 }
 0x277   : > { %v821_v47 = vpop.f32.mrb[11].mxu1  ;;  %v477_v48 = vsel %vm197_vm2, %v476_v44, -1e+30 }
 0x278   : > { %v478_v49 = vsel %vm198_vm1, %v477_v48, -inf }
 0x279   : > { %479 = vmax.xlane.f32.xlu0 %v478_v49 }
 0x27c   : > { %v582_v50 = vpop.f32.mrb[12].mxu1 }
 0x27d   : > { %v588_v51 = vmul.f32 0.35355338, %v582_v50  ;;  %v832_v52 = vpop.f32.mrb[13].mxu1 }
 0x27e   : > { %v585_v53 = vpop.f32.mrb[14].mxu1 }
 0x27f   : > { %v833_v54 = vpop.f32.mrb[15].mxu1  ;;  %v589_v55 = vsel %vm197_vm2, %v588_v51, -1e+30 }
 0x280   : > { %v590_v56 = vsel %vm198_vm1, %v589_v55, -inf }
 0x281   : > { %591 = vmax.xlane.f32.xlu0 %v590_v56 }
 0x282   : > { %376 = vrot.lane.b32.xlu1 %v984_v4, %s924_s24 }
 0x286   : > { %600 = vrot.lane.b32.xlu1 %v984_v4, %s925_s25 }
 0x297   : > { %488 = vrot.lane.b32.xlu0 %v984_v4, %s926_s26 }
 0x2fe   : > { %v368_v57 = vpop.xlane.xlu1 %367 }
 0x2ff   : > { %v369_v58 = vsub.f32 %v365_v41, %v368_v57 }
 0x301   : > { %v370_v59 = vmul.f32 1.442695, %v369_v58 }
 0x302   : > { %v377_v60 = vpop.permute.xlu1 %376 }
 0x303   : > { %880 = vpow2.f32 %v370_v59  ;;  %v382_v61 = vsel %vm265_vm3, %v377_v60, 0 }
 0x304   : > { %811 = vmatpush3.bf16.msra.mxu0 %v382_v61 }
 0x305   : > { %822 = vmatprep.subr.bf16.mxu0 %v918_v0 }
 0x306   : > { %v480_v62 = vpop.xlane.xlu0 %479  ;;  %v601_v11 = vpop.permute.xlu1 %600 }
 0x307   : > { %v481_v63 = vsub.f32 %v477_v48, %v480_v62  ;;  %v606_v15 = vsel %vm265_vm3, %v601_v11, 0 }
 0x309   : > { %v482_v1 = vmul.f32 1.442695, %v481_v63 }
 0x30b   : > { %882 = vpow2.f32 %v482_v1 }
 0x30d   : > { %v881_v2 = vpop.eup %880 }
 0x30e   : > { %v592_v3 = vpop.xlane.xlu0 %591  ;;  %v372_v5 = vsel %vm198_vm1, %v881_v2, 0.0  ;;  %v375_v6 = vpack.c.bf16 %v881_v2, %v881_v2 }
 0x30f   : > { %v593_v4 = vsub.f32 %v589_v55, %v592_v3  ;;  %373 = vadd.xlane.f32.xlu1 %v372_v5 }
 0x310   : > { %813 = vmatmul.mubr.msk.bf16.vlgmr.msra.gmra.mrb[4].mxu0 %vm198_vm1, %v375_v6 }
 0x311   : > { %v594_v7 = vmul.f32 1.442695, %v593_v4  ;;  %824 = vmatprep.mubr.msk.bf16.mxu0 %vm919_vm0, %v918_v0 }
 0x312   : > { %v489_v8 = vpop.permute.xlu0 %488 }
 0x313   : > { %884 = vpow2.f32 %v594_v7  ;;  %v494_v10 = vsel %vm265_vm3, %v489_v8, 0  ;;  %254 = vadd.xlane.f32.xlu1 %v253_v9 }
 0x314   : > { %823 = vmatpush3.bf16.msra.mxu0 %v494_v10 }
 0x315   : > { %v883_v12 = vpop.eup %882  ;;  %834 = vmatprep.subr.bf16.mxu0 %v918_v0 }
 0x316   : > { %v484_v13 = vsel %vm198_vm1, %v883_v12, 0.0  ;;  %v487_v14 = vpack.c.bf16 %v883_v12, %v883_v12 }
 0x317   : > { %485 = vadd.xlane.f32.xlu0 %v484_v13 }
 0x318   : > { %825 = vmatmul.mubr.msk.bf16.vlgmr.msra.gmra.mrb[8].mxu0 %vm198_vm1, %v487_v14 }
 0x319   : > { %835 = vmatpush3.bf16.msra.mxu0 %v606_v15  ;;  %836 = vmatprep.mubr.msk.bf16.mxu0 %vm919_vm0, %v918_v0 }
 0x31d   : > { %v885_v16 = vpop.eup %884 }
 0x31e   : > { %v596_v17 = vsel %vm198_vm1, %v885_v16, 0.0  ;;  %v599_v18 = vpack.c.bf16 %v885_v16, %v885_v16 }
 0x31f   : > { %597 = vadd.xlane.f32.xlu0 %v596_v17 }
 0x320   : > { %837 = vmatmul.mubr.msk.bf16.vlgmr.msra.gmra.mrb[12].mxu0 %vm198_vm1, %v599_v18 }
 0x39c   : > { %v374_v19 = vpop.xlane.xlu1 %373 }
 0x39d   : > { %886 = vrcp.f32 %v374_v19 }
 0x3a0   : > { %v255_v40 = vpop.xlane.xlu1 %254 }
 0x3a4   : > { %v486_v20 = vpop.xlane.xlu0 %485 }
 0x3a5   : > { %888 = vrcp.f32 %v486_v20 }
 0x3a7   : > { %v887_v21 = vpop.eup %886 }
 0x3ac   : > { %v598_v26 = vpop.xlane.xlu0 %597 }
 0x3ad   : > { %890 = vrcp.f32 %v598_v26 }
 0x3ae   : > { %892 = vrcp.f32 %v255_v40 }
 0x3af   : > { %v889_v27 = vpop.eup %888 }
 0x3b7   : > { %v891_v34 = vpop.eup %890 }
 0x3b8   : > { %v893_v41 = vpop.eup %892 }
 0x3b9   : > { %v310_v44 = vmul.f32 %v893_v41, %v1021_v32 }
 0x3e3   : > { %v418_v22 = vpop.f32.mrb[4].mxu0 }
 0x3e4   : > { %v425_v23 = vmul.f32 %v887_v21, %v418_v22  ;;  %v814_v24 = vpop.f32.mrb[5].mxu0 }
 0x3e5   : > { %v421_v25 = vpop.f32.mrb[6].mxu0 }
 0x3e6   : > { %651 = vrot.lane.b32.xlu0 %v425_v23, %s927_s27  ;;  %v815_v0 = vpop.f32.mrb[7].mxu0 }
 0x3eb   : > { %v530_v28 = vpop.f32.mrb[8].mxu0 }
 0x3ec   : > { %v537_v29 = vmul.f32 %v889_v27, %v530_v28  ;;  %v826_v30 = vpop.f32.mrb[9].mxu0 }
 0x3ed   : > { %v533_v31 = vpop.f32.mrb[10].mxu0 }
 0x3ee   : > { %655 = vrot.lane.b32.xlu1 %v537_v29, %s928_s28  ;;  %v827_v33 = vpop.f32.mrb[11].mxu0 }
 0x3f3   : > { %v642_v35 = vpop.f32.mrb[12].mxu0 }
 0x3f4   : > { %v649_v36 = vmul.f32 %v891_v34, %v642_v35  ;;  %v838_v37 = vpop.f32.mrb[13].mxu0 }
 0x3f5   : > { %v645_v38 = vpop.f32.mrb[14].mxu0 }
 0x3f6   : > { %659 = vrot.lane.b32.xlu1 %v649_v36, %s929_s29  ;;  %v839_v39 = vpop.f32.mrb[15].mxu0 }
 0x458   : > { %v652_v42 = vpop.permute.xlu0 %651 }
 0x459   : > { %v662_v45 = vsel %vm198_vm1, %v310_v44, %v652_v42 }
 0x460   : > { %v656_v43 = vpop.permute.xlu1 %655 }
 0x461   : > { %v664_v46 = vsel %vm663_vm4, %v662_v45, %v656_v43 }
 0x468   : > { %v660_v47 = vpop.permute.xlu1 %659 }
 0x469   : > { %v666_v48 = vsel %vm665_vm5, %v664_v46, %v660_v47 }
 0x46a   : > { %v667_v49 = vpack.c.bf16 %v666_v48, %v666_v48 }
 0x46c   : > { %669 = vst.msk [vmem:[%s186_s4] sm:$0xf] %vm668_vm6, %v667_v49 }
 0x46d PF: > { %s12_s11 = sadd.s32 1, %s916_s11   ;;  %s1073_s9 = smov %s912_s10 }
 0x46e   : > { %p9_p5 = scmp.ge.s32.totalorder %s12_s11, 4   ;;  %s1074_s10 = smov %s1076_s12 }
 0x470   :  { %11 = sbr.rel (!%p9_p5) target bundleno = 2 (0x2), region = 61 }

// kernel: transformer_decoder_forward.21
= control target key start
LH: loop header
LB: loop body
LE: loop exit
PB: predicated region body
PF: predicated region fallthrough
CT: control target
= control target key end

     0   :  { %vm22_vm0 = vcmask 519168   ;;  %v184_v1 = vmov 0.0   ;;  %vm54_vm1 = vcmask 261120   ;;  %vm19_vm2 = vcmask 523264   ;;  %s237_s1 = inlined_call_operand.vmem [shape: bf16[32,64], index: 1, kind: input, shape index: {}]   ;;  %s238_s0 = inlined_call_operand.vmem [shape: bf16[20,32], index: 0, kind: input, shape index: {}]   ;;  %s239_s2 = inlined_call_operand.vmem [shape: f32[1,64], index: 2, kind: input, shape index: {}]   ;;  %s240_s3 = inlined_call_operand.vmem [shape: bf16[20,64], index: 3, kind: output, shape index: {}]  }
   0x1   :  { %v180_v0 = vld [vmem:[%s237_s1] sm:$0xff]   ;;  %23 = vst.msk [vmem:[#allocation2 + $0x10] sm:$0xf] %vm22_vm0, %v184_v1  ;;  %v181_v2 = vld [vmem:[%s237_s1 + $0x8] sm:$0xff]   ;;  %vm148_vm3 = vcmask 517120  }
   0x2   :  { %171 = vmatprep.subr.bf16.mxu0 %v180_v0  ;;  %v182_v3 = vld [vmem:[%s238_s0] sm:$0xff]   ;;  %v183_v4 = vld [vmem:[%s238_s0 + $0x8] ss:$0 sps:$4 sm:$0x33]   ;;  %20 = vst.msk [vmem:[#allocation2] sm:$0xff] %vm19_vm2, %v184_v1  ;;  %21 = vst.msk [vmem:[#allocation2 + $0x8] sm:$0xff] %vm19_vm2, %v184_v1 }
   0x3   :  { %172 = vmatpush3.bf16.msra.mxu0 %v180_v0  ;;  %175 = vmatprep.mubr.msk.bf16.mxu0 %vm54_vm1, %v182_v3  ;;  %v160_v15 = vld [vmem:[%s239_s2] ss:$0 sm:$0xff] }
   0x4   :  { %173 = vmatprep.subr.bf16.mxu0 %v181_v2 }
   0x7   :  { %174 = vmatpush3.bf16.msra.mxu0 %v181_v2 }
   0x8   :  { %v26_v5 = vld [vmem:[#allocation2 + $0x10] sm:$0xf] }
   0x9   :  { %v24_v6 = vld [vmem:[#allocation2] sm:$0xff]  ;;  %v25_v10 = vld [vmem:[#allocation2 + $0x8] sm:$0xff] }
   0xa   :  { %176 = vmatmul.mubr.msk.bf16.vlgmr.msra.gmra.mrb[0].mxu0 %vm54_vm1, %v183_v4 }
  0xdd   :  { %v177_v7 = vpop.f32.mrb[0].mxu0 }
  0xde   :  { %v111_v8 = vadd.f32 %v177_v7, %v26_v5  ;;  %v95_v9 = vpop.f32.mrb[1].mxu0 }
  0xdf   :  { %v109_v11 = vadd.f32 %v95_v9, %v24_v6  ;;  %v178_v12 = vpop.f32.mrb[2].mxu0 }
  0xe0   :  { %116 = vst.msk [vmem:[#allocation2 + $0x10] sm:$0xf] %vm22_vm0, %v111_v8  ;;  %v98_v13 = vpop.f32.mrb[3].mxu0 }
  0xe1   :  { %113 = vst.msk [vmem:[#allocation2] sm:$0xff] %vm19_vm2, %v109_v11  ;;  %v110_v14 = vadd.f32 %v98_v13, %v25_v10 }
  0xe3   :  { %114 = vst.msk [vmem:[#allocation2 + $0x8] sm:$0xff] %vm19_vm2, %v110_v14 }
  0xe7   :  { %v122_v16 = vld [vmem:[#allocation2 + $0x10] sm:$0xf] }
  0xe8   :  { %v132_v17 = vadd.f32 %v160_v15, %v122_v16  ;;  %v120_v18 = vld [vmem:[#allocation2] sm:$0xff] }
  0xe9   :  { %v130_v19 = vadd.f32 %v160_v15, %v120_v18 }
  0xea   :  { %v166_v20 = vpack.c.bf16 %v132_v17, %v132_v17  ;;  %v121_v21 = vld [vmem:[#allocation2 + $0x8] sm:$0xff] }
  0xeb   :  { %v164_v22 = vpack.c.bf16 %v130_v19, %v130_v19  ;;  %v131_v23 = vadd.f32 %v160_v15, %v121_v21 }
  0xec   :  { %149 = vst.msk [vmem:[%s240_s3 + $0x8] sm:$0x3] %vm148_vm3, %v166_v20 }
  0xed   :  { %146 = vst.msk [vmem:[%s240_s3] sm:$0xf] %vm22_vm0, %v164_v22  ;;  %v165_v24 = vpack.c.bf16 %v131_v23, %v131_v23 }
  0xef   :  { %147 = vst.msk [vmem:[%s240_s3 + $0x4] sm:$0xf] %vm22_vm0, %v165_v24 }

// kernel: transformer_decoder_forward.33
= control target key start
LH: loop header
LB: loop body
LE: loop exit
PB: predicated region body
PF: predicated region fallthrough
CT: control target
= control target key end

     0   :  { %v136_v0 = vmov 0.0   ;;  %vm137_vm0 = vmmov 0   ;;  %vm46_vm1 = vcmask 261120   ;;  %s176_s1 = inlined_call_operand.vmem [shape: bf16[32,128], index: 1, kind: input, shape index: {}]   ;;  %s177_s0 = inlined_call_operand.vmem [shape: bf16[16,32], index: 0, kind: input, shape index: {}]   ;;  %s178_s2 = inlined_call_operand.vmem [shape: f32[1,128], index: 2, kind: input, shape index: {}]   ;;  %s179_s3 = inlined_call_operand.vmem [shape: f32[16,128], index: 3, kind: output, shape index: {}]  }
   0x1   :  { %123 = vmatprep.subr.bf16.mxu0 %v136_v0  ;;  %v133_v1 = vld [vmem:[%s176_s1] sm:$0xff]   ;;  %127 = vmatprep.mubr.msk.bf16.mxu0 %vm137_vm0, %v136_v0  ;;  %v134_v2 = vld [vmem:[%s176_s1 + $0x8] sm:$0xff]  }
   0x2   :  { %124 = vmatpush3.bf16.msra.mxu0 %v133_v1  ;;  %v135_v3 = vld [vmem:[%s177_s0] sm:$0xff]  }
   0x3   :  { %125 = vmatprep.subr.bf16.mxu0 %v136_v0  ;;  %v119_v4 = vld [vmem:[%s178_s2] ss:$0 sm:$0xff] }
   0x6   :  { %126 = vmatpush3.bf16.msra.mxu0 %v134_v2 }
   0x9   :  { %128 = vmatmul.mubr.msk.bf16.vlgmr.msra.gmra.mrb[0].mxu0 %vm46_vm1, %v135_v3 }
  0xdc   :  { %v84_v5 = vpop.f32.mrb[0].mxu0 }
  0xdd   :  { %v107_v6 = vadd.f32 %v119_v4, %v84_v5  ;;  %v129_v7 = vpop.f32.mrb[1].mxu0 }
  0xde   :  { %v87_v8 = vpop.f32.mrb[2].mxu0 }
  0xdf   :  { %109 = vst [vmem:[%s179_s3] sm:$0xff] %v107_v6  ;;  %v108_v9 = vadd.f32 %v119_v4, %v87_v8  ;;  %v130_v10 = vpop.f32.mrb[3].mxu0 }
  0xe1   :  { %110 = vst [vmem:[%s179_s3 + $0x8] sm:$0xff] %v108_v9 }

// kernel: transformer_decoder_forward.22
= control target key start
LH: loop header
LB: loop body
LE: loop exit
PB: predicated region body
PF: predicated region fallthrough
CT: control target
= control target key end

     0   :  { %s942_s9 = smov 0   ;;  %s944_s10 = smov 0   ;;  %s1053_s0 = inlined_call_operand.vmem [shape: bf16[2,8,32], index: 0, kind: input, shape index: {}]   ;;  %s1054_s1 = inlined_call_operand.vmem [shape: bf16[2,10,64], index: 1, kind: input, shape index: {}]   ;;  %s1055_s2 = inlined_call_operand.vmem [shape: bf16[2,8,32], index: 2, kind: output, shape index: {}]  }
   0x1   :  { %s946_s11 = smov 0  }
   0x2 LB: > { %s24_s12 = sadd.s32 1, %s909_s10  ;;  %p755_p0 = scmp.ge.s32.totalorder %s913_s11, 1  ;;  %s913_s11 = sphi %s946_s11, %s12_s11   ;;  %s909_s10 = sphi %s944_s10, %s1057_s10   ;;  %s905_s9 = sphi %s942_s9, %s1056_s9  }
   0x3   : > { %p26_p1 = scmp.ge.s32.totalorder %s24_s12, 2  ;;  %p140_p2 = scmp.lt.s32.totalorder %s913_s11, 3 }
   0x5   : > { %s1059_s12 = smov (%p26_p1, %s24_s12), 0  ;;  %p141_p3 = pnand %p755_p0, %p140_p2 }
   0x6   : > { %p171_p4 = scmp.lt.s32.totalorder (!%p141_p3), %s905_s9, 1  ;;  %v915_v0 = vmov (!%p141_p3), 0.0   ;;  %vm916_vm0 = vmmov (!%p141_p3), 0   ;;  %vm199_vm1 = vcmask (!%p141_p3), 64512   ;;  %s917_s21 = smov (!%p141_p3), 120   ;;  %vm247_vm2 = vcmask (!%p141_p3), 80896  }
   0x7   : > { %144 = sbr.rel (%p141_p3) target bundleno = 1131 (0x46b), region = 28  ;;  %789 = vmatprep.subr.bf16.mxu0 (!%p141_p3), %v915_v0  ;;  %791 = vmatprep.mubr.msk.bf16.mxu0 (!%p141_p3), %vm916_vm0, %v915_v0  ;;  %s918_s22 = smov (!%p141_p3), 112   ;;  %vm263_vm3 = vcmask (!%p141_p3), 1044480   ;;  %vm658_vm4 = vcmask (!%p141_p3), 130048   ;;  %vm660_vm5 = vcmask (!%p141_p3), 195584   ;;  %vm663_vm6 = vcmask (!%p141_p3), 257024  }
   0x8   : > { %795 = vmatprep.subr.bf16.mxu1 (!%p141_p3), %v915_v0  ;;  %797 = vmatprep.mubr.msk.bf16.mxu1 (!%p141_p3), %vm916_vm0, %v915_v0  ;;  %s919_s23 = smov (!%p141_p3), 104   ;;  %s920_s24 = smov (!%p141_p3), 96  }
   0x9   : > { %s921_s25 = smov (!%p141_p3), 88   ;;  %s922_s26 = smov (!%p141_p3), 72  }
   0xa   : > { %s923_s27 = smov (!%p141_p3), 80   ;;  %s924_s28 = smov (!%p141_p3), 8  }
   0xb   : > { %s925_s29 = smov (!%p141_p3), 16   ;;  %s926_s30 = smov (!%p141_p3), 24  }
   0xe   : > { %s1061_s9 = smov (!%p171_p4, %s905_s9), 1 }
   0xf   : > { %s772_s13 = sshll.u32 %s1061_s9, 3  ;;  %s756_s17 = sshll.u32 %s1061_s9, 2 }
  0x10   : > { %s182_s16 = scalar_lea.vmem %s1054_s1, %s772_s13  ;;  %s177_s20 = scalar_lea.vmem %s1053_s0, %s756_s17 }
  0x11   : > { %v972_v1 = vld [vmem:[%s182_s16] sm:$0x1f]   ;;  %s189_s5 = scalar_lea.vmem %s1055_s2, %s756_s17 }
  0x12   : > { %v204_v2 = vsel %vm199_vm1, %v972_v1, 0  ;;  %v191_v3 = vld [vmem:[%s177_s20] sm:$0xf]  ;;  %314 = vrot.lane.b32.xlu1 %v972_v1, %s917_s21 }
  0x13   : > { %790 = vmatpush3.bf16.xpose.msra.mxu0 %v204_v2  ;;  %v763_v4 = vcombine.low %v191_v3, %v191_v3 }
  0x14   : > { %807 = vmatprep.subr.bf16.mxu0 %v915_v0 }
  0x16   : > { %312 = vrot.lane.b32.xlu1 %v763_v4, %s917_s21 }
  0x1a   : > { %792 = vmatmul.mubr.msk.bf16.vlgmr.msra.gmra.mrb[0].mxu0 %vm199_vm1, %v191_v3  ;;  %425 = vrot.lane.b32.xlu1 %v972_v1, %s918_s22 }
  0x1b   : > { %809 = vmatprep.mubr.msk.bf16.mxu0 %vm916_vm0, %v915_v0 }
  0x1e   : > { %423 = vrot.lane.b32.xlu1 %v763_v4, %s918_s22 }
  0x22   : > { %536 = vrot.lane.b32.xlu1 %v972_v1, %s919_s23 }
  0x26   : > { %534 = vrot.lane.b32.xlu1 %v763_v4, %s919_s23 }
  0x84   : > { %v315_v16 = vpop.permute.xlu1 %314 }
  0x85   : > { %v320_v19 = vsel %vm199_vm1, %v315_v16, 0 }
  0x88   : > { %v313_v17 = vpop.permute.xlu1 %312 }
  0x8c   : > { %v426_v21 = vpop.permute.xlu1 %425 }
  0x8d   : > { %v431_v23 = vsel %vm199_vm1, %v426_v21, 0 }
  0x90   : > { %v424_v22 = vpop.permute.xlu1 %423 }
  0x94   : > { %v537_v24 = vpop.permute.xlu1 %536 }
  0x95   : > { %v542_v25 = vsel %vm199_vm1, %v537_v24, 0 }
  0x98   : > { %v535_v26 = vpop.permute.xlu1 %534 }
  0xed   : > { %v240_v5 = vpop.f32.mrb[0].mxu0 }
  0xee   : > { %v246_v6 = vmul.f32 0.35355338, %v240_v5  ;;  %v793_v7 = vpop.f32.mrb[1].mxu0 }
  0xef   : > { %v243_v8 = vpop.f32.mrb[2].mxu0 }
  0xf0   : > { %v794_v9 = vpop.f32.mrb[3].mxu0  ;;  %v248_v10 = vsel %vm247_vm2, %v246_v6, -inf }
  0xf1   : > { %249 = vmax.xlane.f32.xlu0 %v248_v10 }
 0x107   : > { %258 = vrot.lane.b32.xlu0 %v972_v1, %s920_s24 }
 0x17e   : > { %v250_v11 = vpop.xlane.xlu0 %249 }
 0x17f   : > { %v251_v12 = vsub.f32 %v246_v6, %v250_v11 }
 0x181   : > { %v252_v13 = vmul.f32 1.442695, %v251_v12 }
 0x182   : > { %v259_v14 = vpop.permute.xlu0 %258 }
 0x183   : > { %875 = vpow2.f32 %v252_v13  ;;  %v265_v15 = vsel %vm263_vm3, %v259_v14, 0 }
 0x184   : > { %796 = vmatpush3.bf16.msra.mxu1 %v265_v15 }
 0x185   : > { %801 = vmatprep.subr.bf16.mxu1 %v915_v0 }
 0x18d   : > { %v993_v18 = vpop.eup %875 }
 0x18e   : > { %v257_v20 = vpack.c.bf16 %v993_v18, %v993_v18 }
 0x190   : > { %798 = vmatmul.mubr.msk.bf16.vlgmr.msra.gmra.mrb[0].mxu1 %vm247_vm2, %v257_v20 }
 0x191   : > { %802 = vmatpush3.bf16.xpose.msra.mxu1 %v320_v19  ;;  %803 = vmatprep.mubr.msk.bf16.mxu1 %vm916_vm0, %v915_v0 }
 0x192   : > { %813 = vmatprep.subr.bf16.mxu1 %v915_v0 }
 0x198   : > { %804 = vmatmul.mubr.msk.bf16.vlgmr.msra.gmra.mrb[4].mxu1 %vm199_vm1, %v313_v17 }
 0x199   : > { %814 = vmatpush3.bf16.xpose.msra.mxu1 %v431_v23  ;;  %815 = vmatprep.mubr.msk.bf16.mxu1 %vm916_vm0, %v915_v0 }
 0x19a   : > { %825 = vmatprep.subr.bf16.mxu1 %v915_v0 }
 0x1a0   : > { %816 = vmatmul.mubr.msk.bf16.vlgmr.msra.gmra.mrb[8].mxu1 %vm199_vm1, %v424_v22 }
 0x1a1   : > { %826 = vmatpush3.bf16.xpose.msra.mxu1 %v542_v25  ;;  %827 = vmatprep.mubr.msk.bf16.mxu1 %vm916_vm0, %v915_v0 }
 0x1a8   : > { %828 = vmatmul.mubr.msk.bf16.vlgmr.msra.gmra.mrb[12].mxu1 %vm199_vm1, %v535_v26 }
 0x263   : > { %v1012_v27 = vpop.f32.mrb[0].mxu1 }
 0x264   : > { %v799_v28 = vpop.f32.mrb[1].mxu1 }
 0x265   : > { %v304_v29 = vpop.f32.mrb[2].mxu1 }
 0x266   : > { %v800_v30 = vpop.f32.mrb[3].mxu1 }
 0x26b   : > { %v356_v31 = vpop.f32.mrb[4].mxu1 }
 0x26c   : > { %v362_v32 = vmul.f32 0.35355338, %v356_v31  ;;  %v805_v33 = vpop.f32.mrb[5].mxu1 }
 0x26d   : > { %v359_v34 = vpop.f32.mrb[6].mxu1 }
 0x26e   : > { %v806_v35 = vpop.f32.mrb[7].mxu1  ;;  %v363_v36 = vsel %vm247_vm2, %v362_v32, -inf }
 0x26f   : > { %364 = vmax.xlane.f32.xlu1 %v363_v36 }
 0x273   : > { %v467_v37 = vpop.f32.mrb[8].mxu1 }
 0x274   : > { %v473_v38 = vmul.f32 0.35355338, %v467_v37  ;;  %v817_v39 = vpop.f32.mrb[9].mxu1 }
 0x275   : > { %v470_v40 = vpop.f32.mrb[10].mxu1 }
 0x276   : > { %v818_v41 = vpop.f32.mrb[11].mxu1  ;;  %v474_v42 = vsel %vm247_vm2, %v473_v38, -inf }
 0x277   : > { %475 = vmax.xlane.f32.xlu0 %v474_v42 }
 0x27b   : > { %v578_v43 = vpop.f32.mrb[12].mxu1 }
 0x27c   : > { %v584_v44 = vmul.f32 0.35355338, %v578_v43  ;;  %v829_v45 = vpop.f32.mrb[13].mxu1 }
 0x27d   : > { %v581_v46 = vpop.f32.mrb[14].mxu1 }
 0x27e   : > { %v830_v47 = vpop.f32.mrb[15].mxu1  ;;  %v585_v48 = vsel %vm247_vm2, %v584_v44, -inf }
 0x27f   : > { %586 = vmax.xlane.f32.xlu0 %v585_v48 }
 0x280   : > { %373 = vrot.lane.b32.xlu1 %v972_v1, %s921_s25 }
 0x284   : > { %595 = vrot.lane.b32.xlu1 %v972_v1, %s922_s26 }
 0x295   : > { %484 = vrot.lane.b32.xlu0 %v972_v1, %s923_s27  ;;  %v254_v1 = vsel %vm247_vm2, %v993_v18, 0.0 }
 0x2fc   : > { %v365_v49 = vpop.xlane.xlu1 %364 }
 0x2fd   : > { %v366_v50 = vsub.f32 %v362_v32, %v365_v49 }
 0x2ff   : > { %v367_v51 = vmul.f32 1.442695, %v366_v50 }
 0x300   : > { %v374_v52 = vpop.permute.xlu1 %373 }
 0x301   : > { %877 = vpow2.f32 %v367_v51  ;;  %v379_v53 = vsel %vm263_vm3, %v374_v52, 0 }
 0x302   : > { %808 = vmatpush3.bf16.msra.mxu0 %v379_v53 }
 0x303   : > { %819 = vmatprep.subr.bf16.mxu0 %v915_v0 }
 0x304   : > { %v476_v54 = vpop.xlane.xlu0 %475  ;;  %v596_v3 = vpop.permute.xlu1 %595 }
 0x305   : > { %v477_v55 = vsub.f32 %v473_v38, %v476_v54  ;;  %v601_v7 = vsel %vm263_vm3, %v596_v3, 0 }
 0x307   : > { %v478_v56 = vmul.f32 1.442695, %v477_v55 }
 0x309   : > { %879 = vpow2.f32 %v478_v56 }
 0x30b   : > { %v878_v57 = vpop.eup %877 }
 0x30c   : > { %v587_v58 = vpop.xlane.xlu0 %586  ;;  %v369_v59 = vsel %vm247_vm2, %v878_v57, 0.0  ;;  %v372_v60 = vpack.c.bf16 %v878_v57, %v878_v57 }
 0x30d   : > { %v588_v61 = vsub.f32 %v584_v44, %v587_v58  ;;  %370 = vadd.xlane.f32.xlu1 %v369_v59 }
 0x30e   : > { %810 = vmatmul.mubr.msk.bf16.vlgmr.msra.gmra.mrb[4].mxu0 %vm247_vm2, %v372_v60 }
 0x30f   : > { %v589_v62 = vmul.f32 1.442695, %v588_v61  ;;  %821 = vmatprep.mubr.msk.bf16.mxu0 %vm916_vm0, %v915_v0 }
 0x310   : > { %v485_v63 = vpop.permute.xlu0 %484 }
 0x311   : > { %881 = vpow2.f32 %v589_v62  ;;  %v490_v2 = vsel %vm263_vm3, %v485_v63, 0  ;;  %255 = vadd.xlane.f32.xlu1 %v254_v1 }
 0x312   : > { %820 = vmatpush3.bf16.msra.mxu0 %v490_v2 }
 0x313   : > { %v880_v4 = vpop.eup %879  ;;  %831 = vmatprep.subr.bf16.mxu0 %v915_v0 }
 0x314   : > { %v480_v5 = vsel %vm247_vm2, %v880_v4, 0.0  ;;  %v483_v6 = vpack.c.bf16 %v880_v4, %v880_v4 }
 0x315   : > { %481 = vadd.xlane.f32.xlu0 %v480_v5 }
 0x316   : > { %822 = vmatmul.mubr.msk.bf16.vlgmr.msra.gmra.mrb[8].mxu0 %vm247_vm2, %v483_v6 }
 0x317   : > { %832 = vmatpush3.bf16.msra.mxu0 %v601_v7  ;;  %833 = vmatprep.mubr.msk.bf16.mxu0 %vm916_vm0, %v915_v0 }
 0x31b   : > { %v882_v8 = vpop.eup %881 }
 0x31c   : > { %v591_v9 = vsel %vm247_vm2, %v882_v8, 0.0  ;;  %v594_v10 = vpack.c.bf16 %v882_v8, %v882_v8 }
 0x31d   : > { %592 = vadd.xlane.f32.xlu0 %v591_v9 }
 0x31e   : > { %834 = vmatmul.mubr.msk.bf16.vlgmr.msra.gmra.mrb[12].mxu0 %vm247_vm2, %v594_v10 }
 0x39a   : > { %v371_v11 = vpop.xlane.xlu1 %370 }
 0x39b   : > { %883 = vrcp.f32 %v371_v11 }
 0x39e   : > { %v256_v32 = vpop.xlane.xlu1 %255 }
 0x3a2   : > { %v482_v12 = vpop.xlane.xlu0 %481 }
 0x3a3   : > { %885 = vrcp.f32 %v482_v12 }
 0x3a5   : > { %v884_v13 = vpop.eup %883 }
 0x3aa   : > { %v593_v18 = vpop.xlane.xlu0 %592 }
 0x3ab   : > { %887 = vrcp.f32 %v593_v18 }
 0x3ac   : > { %889 = vrcp.f32 %v256_v32 }
 0x3ad   : > { %v886_v19 = vpop.eup %885 }
 0x3b5   : > { %v888_v25 = vpop.eup %887 }
 0x3b6   : > { %v890_v33 = vpop.eup %889 }
 0x3b7   : > { %v308_v36 = vmul.f32 %v890_v33, %v1012_v27 }
 0x3e1   : > { %v415_v14 = vpop.f32.mrb[4].mxu0 }
 0x3e2   : > { %v422_v15 = vmul.f32 %v884_v13, %v415_v14  ;;  %v811_v16 = vpop.f32.mrb[5].mxu0 }
 0x3e3   : > { %v418_v17 = vpop.f32.mrb[6].mxu0 }
 0x3e4   : > { %646 = vrot.lane.b32.xlu0 %v422_v15, %s924_s28  ;;  %v812_v0 = vpop.f32.mrb[7].mxu0 }
 0x3e9   : > { %v526_v20 = vpop.f32.mrb[8].mxu0 }
 0x3ea   : > { %v533_v21 = vmul.f32 %v886_v19, %v526_v20  ;;  %v823_v22 = vpop.f32.mrb[9].mxu0 }
 0x3eb   : > { %v529_v23 = vpop.f32.mrb[10].mxu0 }
 0x3ec   : > { %650 = vrot.lane.b32.xlu1 %v533_v21, %s925_s29  ;;  %v824_v24 = vpop.f32.mrb[11].mxu0 }
 0x3f1   : > { %v637_v26 = vpop.f32.mrb[12].mxu0 }
 0x3f2   : > { %v644_v28 = vmul.f32 %v888_v25, %v637_v26  ;;  %v835_v29 = vpop.f32.mrb[13].mxu0 }
 0x3f3   : > { %v640_v30 = vpop.f32.mrb[14].mxu0 }
 0x3f4   : > { %654 = vrot.lane.b32.xlu1 %v644_v28, %s926_s30  ;;  %v836_v31 = vpop.f32.mrb[15].mxu0 }
 0x456   : > { %v647_v34 = vpop.permute.xlu0 %646 }
 0x457   : > { %v657_v37 = vsel %vm199_vm1, %v308_v36, %v647_v34 }
 0x45e   : > { %v651_v35 = vpop.permute.xlu1 %650 }
 0x45f   : > { %v659_v38 = vsel %vm658_vm4, %v657_v37, %v651_v35 }
 0x466   : > { %v655_v39 = vpop.permute.xlu1 %654 }
 0x467   : > { %v661_v40 = vsel %vm660_vm5, %v659_v38, %v655_v39 }
 0x468   : > { %v662_v41 = vpack.c.bf16 %v661_v40, %v661_v40 }
 0x46a   : > { %664 = vst.msk [vmem:[%s189_s5] sm:$0xf] %vm663_vm6, %v662_v41 }
 0x46b PF: > { %s12_s11 = sadd.s32 1, %s913_s11   ;;  %s1056_s9 = smov %s909_s10 }
 0x46c   : > { %p9_p5 = scmp.ge.s32.totalorder %s12_s11, 4   ;;  %s1057_s10 = smov %s1059_s12 }
 0x46e   :  { %11 = sbr.rel (!%p9_p5) target bundleno = 2 (0x2), region = 61 }

// kernel: transformer_decoder_forward.24
= control target key start
LH: loop header
LB: loop body
LE: loop exit
PB: predicated region body
PF: predicated region fallthrough
CT: control target
= control target key end

     0   :  { %v312_v0 = vmov 0.0   ;;  %vm313_vm0 = vmmov 0   ;;  %vm57_vm1 = vcmask 261120   ;;  %vm144_vm2 = vcmask 523264   ;;  %s398_s1 = inlined_call_operand.vmem [shape: bf16[32,64], index: 1, kind: input, shape index: {}]   ;;  %s399_s0 = inlined_call_operand.vmem [shape: bf16[16,32], index: 0, kind: input, shape index: {}]   ;;  %s400_s3 = inlined_call_operand.vmem [shape: bf16[64,32], index: 3, kind: input, shape index: {}]   ;;  %s401_s2 = inlined_call_operand.vmem [shape: f32[1,64], index: 2, kind: input, shape index: {}]   ;;  %s402_s4 = inlined_call_operand.vmem [shape: f32[1,32], index: 4, kind: input, shape index: {}]   ;;  %s403_s5 = inlined_call_operand.vmem [shape: f32[1,32], index: 5, kind: input, shape index: {}]   ;;  %s404_s6 = inlined_call_operand.vmem [shape: f32[1,32], index: 6, kind: input, shape index: {}]   ;;  %s405_s7 = inlined_call_operand.vmem [shape: bf16[16,32], index: 7, kind: output, shape index: {}]  }
   0x1   :  { %278 = vmatprep.subr.bf16.mxu0 %v312_v0  ;;  %v300_v1 = vld [vmem:[%s398_s1] sm:$0xff]   ;;  %282 = vmatprep.mubr.msk.bf16.mxu0 %vm313_vm0, %v312_v0  ;;  %v301_v2 = vld [vmem:[%s398_s1 + $0x8] sm:$0xff]   ;;  %v305_v6 = vld [vmem:[%s400_s3 + $0x10] sm:$0xff]   ;;  %vm246_vm3 = vcmask 257024  }
   0x2   :  { %286 = vmatprep.subr.bf16.mxu1 %v312_v0  ;;  %294 = vmatprep.mubr.msk.bf16.mxu1 %vm313_vm0, %v312_v0  ;;  %v27_v3 = vld [vmem:[%s399_s0] sm:$0xff]   ;;  %v304_v5 = vld [vmem:[%s400_s3 + $0x8] sm:$0xff]   ;;  %v306_v7 = vld [vmem:[%s400_s3 + $0x18] sm:$0xff]  }
   0x3   :  { %279 = vmatpush3.bf16.msra.mxu0 %v300_v1  ;;  %v303_v4 = vld [vmem:[%s400_s3] sm:$0xff]   ;;  %v189_v19 = vunpack.c.l.bf16 %v27_v3  ;;  %v190_v23 = vunpack.c.h.bf16 %v27_v3 }
   0x4   :  { %280 = vmatprep.subr.bf16.mxu0 %v312_v0  ;;  %287 = vmatpush3.bf16.msra.mxu1 %v303_v4  ;;  %v253_v8 = vld [vmem:[%s401_s2] ss:$0 sm:$0xff] }
   0x5   :  { %288 = vmatprep.subr.bf16.mxu1 %v312_v0  ;;  %v258_v18 = vld [vmem:[%s402_s4] ss:$0 sm:$0xff] }
   0x6   :  { %v264_v48 = vld [vmem:[%s403_s5] ss:$0 sm:$0xff] }
   0x7   :  { %281 = vmatpush3.bf16.msra.mxu0 %v301_v2  ;;  %v265_v50 = vld [vmem:[%s404_s6] ss:$0 sm:$0xff] }
   0x8   :  { %289 = vmatpush3.bf16.msra.mxu1 %v304_v5 }
   0x9   :  { %290 = vmatprep.subr.bf16.mxu1 %v312_v0 }
   0xa   :  { %283 = vmatmul.mubr.msk.bf16.vlgmr.msra.gmra.mrb[0].mxu0 %vm57_vm1, %v27_v3 }
   0xc   :  { %291 = vmatpush3.bf16.msra.mxu1 %v305_v6 }
   0xd   :  { %292 = vmatprep.subr.bf16.mxu1 %v312_v0 }
  0x10   :  { %293 = vmatpush3.bf16.msra.mxu1 %v306_v7 }
  0xdd   :  { %v95_v9 = vpop.f32.mrb[0].mxu0 }
  0xde   :  { %v96_v10 = vadd.f32 %v253_v8, %v95_v9  ;;  %v284_v11 = vpop.f32.mrb[1].mxu0 }
  0xdf   :  { %v98_v12 = vpop.f32.mrb[2].mxu0 }
  0xe0   :  { %v99_v13 = vadd.f32 %v253_v8, %v98_v12  ;;  %v285_v14 = vpop.f32.mrb[3].mxu0  ;;  %v102_v15 = vmax.f32 %v96_v10, 0.0 }
  0xe2   :  { %v103_v16 = vmax.f32 %v99_v13, 0.0 }
  0xe4   :  { %v104_v17 = vpack.c.bf16 %v103_v16, %v102_v15 }
  0xe6   :  { %295 = vmatmul.mubr.msk.bf16.vlgmr.msra.gmra.mrb[0].mxu1 %vm144_vm2, %v104_v17 }
 0x1b9   :  { %v182_v20 = vpop.f32.mrb[0].mxu1 }
 0x1ba   :  { %v183_v21 = vadd.f32 %v258_v18, %v182_v20  ;;  %v296_v22 = vpop.f32.mrb[1].mxu1 }
 0x1bb   :  { %v185_v24 = vpop.f32.mrb[2].mxu1 }
 0x1bc   :  { %v186_v25 = vadd.f32 %v258_v18, %v185_v24  ;;  %v297_v26 = vpop.f32.mrb[3].mxu1  ;;  %v191_v27 = vadd.f32 %v189_v19, %v183_v21 }
 0x1be   :  { %v193_v28 = vsel %vm57_vm1, %v191_v27, 0.0  ;;  %v192_v29 = vadd.f32 %v190_v23, %v186_v25 }
 0x1bf   :  { %194 = vadd.xlane.f32.xlu0 %v193_v28 }
 0x1c0   :  { %v196_v30 = vsel %vm57_vm1, %v192_v29, 0.0 }
 0x1c3   :  { %197 = vadd.xlane.f32.xlu0 %v196_v30 }
 0x24c   :  { %v195_v31 = vpop.xlane.xlu0 %194 }
 0x24d   :  { %v200_v32 = vmul.f32 0.03125, %v195_v31 }
 0x24f   :  { %v202_v33 = vsub.f32 %v191_v27, %v200_v32 }
 0x250   :  { %v198_v34 = vpop.xlane.xlu0 %197 }
 0x251   :  { %v201_v35 = vmul.f32 0.03125, %v198_v34  ;;  %v204_v36 = vmul.f32 %v202_v33, %v202_v33 }
 0x253   :  { %v203_v37 = vsub.f32 %v192_v29, %v201_v35  ;;  %v206_v38 = vsel %vm57_vm1, %v204_v36, 0.0 }
 0x254   :  { %207 = vadd.xlane.f32.xlu1 %v206_v38 }
 0x255   :  { %v205_v39 = vmul.f32 %v203_v37, %v203_v37 }
 0x257   :  { %v209_v40 = vsel %vm57_vm1, %v205_v39, 0.0 }
 0x258   :  { %210 = vadd.xlane.f32.xlu1 %v209_v40 }
 0x2e1   :  { %v208_v41 = vpop.xlane.xlu1 %207 }
 0x2e2   :  { %v212_v42 = vmul.f32 0.03125, %v208_v41 }
 0x2e4   :  { %v214_v43 = vadd.f32 1e-05, %v212_v42 }
 0x2e5   :  { %v211_v44 = vpop.xlane.xlu1 %210 }
 0x2e6   :  { %308 = vrsqrt.f32 %v214_v43  ;;  %v213_v45 = vmul.f32 0.03125, %v211_v44 }
 0x2e8   :  { %v215_v46 = vadd.f32 1e-05, %v213_v45 }
 0x2ea   :  { %310 = vrsqrt.f32 %v215_v46 }
 0x2f0   :  { %v309_v47 = vpop.eup %308 }
 0x2f1   :  { %v218_v49 = vmul.f32 %v309_v47, %v202_v33 }
 0x2f3   :  { %v227_v51 = vmul.f32 %v264_v48, %v218_v49 }
 0x2f4   :  { %v311_v52 = vpop.eup %310 }
 0x2f5   :  { %v236_v53 = vadd.f32 %v265_v50, %v227_v51  ;;  %v219_v54 = vmul.f32 %v311_v52, %v203_v37 }
 0x2f7   :  { %v268_v55 = vpack.c.bf16 %v236_v53, %v236_v53  ;;  %v228_v56 = vmul.f32 %v264_v48, %v219_v54 }
 0x2f9   :  { %247 = vst.msk [vmem:[%s405_s7] sm:$0xf] %vm246_vm3, %v268_v55  ;;  %v237_v57 = vadd.f32 %v265_v50, %v228_v56 }
 0x2fb   :  { %v269_v58 = vpack.c.bf16 %v237_v57, %v237_v57 }
 0x2fd   :  { %248 = vst.msk [vmem:[%s405_s7 + $0x4] sm:$0xf] %vm246_vm3, %v269_v58 }

</bundles_post_ra>
